<compile_context>
chip_gen: v7x
topology: tpu7x:2x2x1
jax: 0.10.0
libtpu: 0.0.40
codegen_flags: <defaults>
</compile_context>

<pallas_src>
import functools

import numpy as np

import jax
import jax.numpy as jnp
from jax import lax
from jax.experimental import pallas as pl
from jax.experimental.pallas import tpu as pltpu

EPS = 1e-6
_TWO32 = 4294967296.0  # 2 ** 32


def _round_up(a, m):
    return (a + m - 1) // m * m


def _bits_to_i32(bits):
    if bits.dtype == jnp.int32:
        return bits
    return pltpu.bitcast(bits, jnp.int32)


def _sigmoid_family(logits, approx_recip):
    """Returns (sigmoid, log_sigmoid, log(1-sigmoid)) sharing one exp/log/recip."""
    e = jnp.exp(-jnp.abs(logits))
    one_pe = 1.0 + e
    log1pe = jnp.log(one_pe)
    log_s = jnp.minimum(logits, 0.0) - log1pe      # log sigmoid(logits)
    log_1ms = log_s - logits                       # log (1 - sigmoid(logits))
    if approx_recip:
        r = pl.reciprocal(one_pe, approx=True)     # EUP slot, nearly free
    else:
        r = 1.0 / one_pe
    sig = jnp.where(logits >= 0.0, r, e * r)
    return sig, log_s, log_1ms


def _sbn_body(xin_ref, u_ref, ut_ref, xb_ref, zb_ref,
              q_ref, sz_ref, ps_ref, xout_ref, elbo_ref,
              lq_ref, lp_ref, *, nz, nx, draw_z, draw_x, approx_recip):
    S, tb, nzp = sz_ref.shape
    nxp = ps_ref.shape[2]

    xin_bf = xin_ref[...]                          # (tb, nxp) bf16 (binary data)
    xin_f = xin_bf.astype(jnp.float32)
    U = u_ref[...]                                 # (nzp, nxp) bf16
    Ut = ut_ref[...]                               # (nxp, nzp) bf16 (pre-transposed)
    xb = xb_ref[...]                               # (1, nxp) f32
    zb = zb_ref[...]                               # (1, nzp) f32

    # Lane masks for zero-padded tail columns (None when already 128-aligned).
    mz = None
    if nz != nzp:
        mz = (lax.broadcasted_iota(jnp.int32, (1, nzp), 1) < nz).astype(jnp.float32)
    mx = None
    if nx != nxp:
        mx = (lax.broadcasted_iota(jnp.int32, (1, nxp), 1) < nx).astype(jnp.float32)

    def _masked(v, m):
        return v if m is None else v * m

    # ---- inference q(z=1|x) = sigmoid(x @ U^T + z_bias) ---------------------
    logits_z = jnp.dot(xin_bf, Ut, preferred_element_type=jnp.float32) + zb
    sig_z, log_q, log_1mq = _sigmoid_family(logits_z, approx_recip)
    q_c = jnp.clip(sig_z, EPS, 1.0 - EPS)          # smooth_distribution(q)
    q_ref[...] = q_c

    # term2 = sum q log q + (1 - q) log(1 - q)   (padded columns masked out)
    term2 = jnp.sum(_masked(q_c * log_q + (1.0 - q_c) * log_1mq, mz))

    # Integer Bernoulli threshold: P(int32_bits < t) == q for t = (q - 0.5) * 2^32.
    thresh_z = ((q_c - 0.5) * _TWO32).astype(jnp.int32)

    # Prior p(z=1) = sigmoid(z_bias); log p(z=0) = -softplus(z_bias).
    log_pz0 = jnp.minimum(-zb, 0.0) - jnp.log(1.0 + jnp.exp(-jnp.abs(zb)))

    def per_sample(s, carry):
        # ---- sample z_s ~ Bernoulli(q) ---------------------------------------
        zbool = draw_z(s) < thresh_z                               # (tb, nzp)
        z_bf = zbool.astype(jnp.bfloat16)
        z_f = zbool.astype(jnp.float32)
        sz_ref[s] = z_bf

        # Binary-sample identity: z*log p + (1-z)*log(1-p) = log(1-p) + z*logit.
        lq_s = jnp.sum(_masked(log_1mq + z_f * logits_z, mz), axis=1, keepdims=True)
        lpz_s = jnp.sum(_masked(log_pz0 + z_f * zb, mz), axis=1, keepdims=True)

        # ---- generator p(x=1|z_s): (tb, nzp) x (nzp, nxp) MXU call -----------
        logits_x = jnp.dot(z_bf, U, preferred_element_type=jnp.float32) + xb
        sig_x, _log_p1, log_p0 = _sigmoid_family(logits_x, approx_recip)
        ps_c = jnp.clip(sig_x, EPS, 1.0 - EPS)
        ps_ref[s] = ps_c.astype(jnp.bfloat16)

        # ---- sample xout ~ Bernoulli(ps) --------------------------------------
        thresh_x = ((ps_c - 0.5) * _TWO32).astype(jnp.int32)
        xout_ref[s] = (draw_x(s) < thresh_x).astype(jnp.bfloat16)

        # log p(xin | z_s)
        lpx_s = jnp.sum(_masked(log_p0 + xin_f * logits_x, mx), axis=1, keepdims=True)

        lq_ref[s] = lq_s
        lp_ref[s] = lpz_s + lpx_s
        return carry

    lax.fori_loop(0, S, per_sample, 0, unroll=bool(S <= 4))

    # ---- term1: numerically stable weighted average in log space ------------
    lq = lq_ref[...]                               # (S, tb, 1)
    lp = lp_ref[...]
    lq_max = jnp.max(lq, axis=0, keepdims=True)
    w = jnp.exp(lq - lq_max)
    neg_lp = jnp.maximum(-lp, 1e-30)               # Bernoulli log-probs are <= 0
    neg_num = lq_max + jnp.log(jnp.sum(w * neg_lp, axis=0, keepdims=True))
    pos_den = lq_max + jnp.log(jnp.sum(w, axis=0, keepdims=True))
    term1 = -1.0 * jnp.sum(jnp.exp(neg_num - pos_den))

    partial = term1 - term2
    # Lane-dense (8,128) store with the scalar partial at [0, 0].
    row = lax.broadcasted_iota(jnp.int32, (8, 128), 0)
    col = lax.broadcasted_iota(jnp.int32, (8, 128), 1)
    elbo_ref[...] = jnp.where((row == 0) & (col == 0), partial, 0.0)


def _sbn_kernel_hw_prng(seed_ref, xin_ref, u_ref, ut_ref, xb_ref, zb_ref,
                        q_ref, sz_ref, ps_ref, xout_ref, elbo_ref,
                        lq_ref, lp_ref, *, nz, nx):
    S, tb, nzp = sz_ref.shape
    nxp = ps_ref.shape[2]
    # Hash (seed, block) together so consecutive seeds do not alias streams.
    pltpu.prng_seed(seed_ref[0], pl.program_id(0))
    draw_z = lambda s: _bits_to_i32(pltpu.prng_random_bits((tb, nzp)))
    draw_x = lambda s: _bits_to_i32(pltpu.prng_random_bits((tb, nxp)))
    _sbn_body(xin_ref, u_ref, ut_ref, xb_ref, zb_ref,
              q_ref, sz_ref, ps_ref, xout_ref, elbo_ref, lq_ref, lp_ref,
              nz=nz, nx=nx, draw_z=draw_z, draw_x=draw_x, approx_recip=True)


def _sbn_kernel_host_rng(xin_ref, u_ref, ut_ref, xb_ref, zb_ref, rz_ref, rx_ref,
                         q_ref, sz_ref, ps_ref, xout_ref, elbo_ref,
                         lq_ref, lp_ref, *, nz, nx):
    # Fallback for backends without the TPU hardware PRNG (e.g. interpret mode).
    draw_z = lambda s: rz_ref[s]
    draw_x = lambda s: rx_ref[s]
    _sbn_body(xin_ref, u_ref, ut_ref, xb_ref, zb_ref,
              q_ref, sz_ref, ps_ref, xout_ref, elbo_ref, lq_ref, lp_ref,
              nz=nz, nx=nx, draw_z=draw_z, draw_x=draw_x, approx_recip=False)


def _vmem_capacity_bytes():
    try:
        return int(pltpu.get_tpu_info().vmem_capacity_bytes)
    except Exception:
        return 64 * 1024 * 1024


def _block_footprint_bytes(tb, S, nzp, nxp):
    # Double-buffered pipeline blocks (outputs bf16 except q, input xin bf16,
    # weights bf16) + an estimate of live f32 temporaries + scratch.
    outs = 2 * (S * tb * (2 * nxp + 2 * nxp + 2 * nzp) + tb * nzp * 4 + 8 * 128 * 4)
    ins = 2 * tb * nxp * 2
    weights = 2 * 2 * nzp * nxp * 2
    temps = 5 * tb * nzp * 4 + 7 * tb * nxp * 4
    scratch = 2 * S * tb * 4
    return outs + ins + weights + temps + scratch


def _pick_tb(B, S, nzp, nxp, vmem_cap):
    budget = int(0.6 * vmem_cap)
    cands = [c for c in (512, 384, 256, 192, 128, 96, 64, 32, 16, 8)
             if c <= B and B % c == 0]
    if not cands:
        return B
    fitting = [c for c in cands if _block_footprint_bytes(c, S, nzp, nxp) <= budget]
    pool = fitting if fitting else [min(cands)]
    multi = [c for c in pool if B // c >= 2]       # G >= 2 -> both TCs on v7x
    return max(multi) if multi else max(pool)


def sbn_forward(xin, U, x_bias, z_bias, S=1, seed=0, tb=None):
    """Forward pass of the single-layer SBN.

    Returns (q, samples_z, ps, xouts, full_elbo) matching SBN.forward.
    samples_z / ps / xouts are returned as bfloat16 (binary samples are exact).
    """
    xin = jnp.asarray(xin, jnp.float32)
    U = jnp.asarray(U, jnp.float32)
    x_bias = jnp.asarray(x_bias, jnp.float32)
    z_bias = jnp.asarray(z_bias, jnp.float32)

    B, nx = xin.shape
    nz = U.shape[0]
    nzp = _round_up(nz, 128)                       # lane-dense stores, aligned MXU tiles
    nxp = _round_up(nx, 128)

    on_tpu = jax.default_backend() == "tpu"
    vmem_cap = _vmem_capacity_bytes() if on_tpu else 128 * 1024 * 1024

    if tb is None:
        tb = _pick_tb(B, S, nzp, nxp, vmem_cap)
    # TODO(synk): pad / mask a ragged final batch block instead of asserting.
    assert B % tb == 0, "batch size must be divisible by the batch tile"
    assert tb == B or tb % 8 == 0, "batch tile must be a multiple of 8 (or == B)"
    G = B // tb

    # Padded bf16 weights / inputs (binary x and z are lossless in bf16).
    U_p = jnp.pad(U, ((0, nzp - nz), (0, nxp - nx)))
    U_bf = U_p.astype(jnp.bfloat16)                # (nzp, nxp) generator weights
    Ut_bf = U_p.T.astype(jnp.bfloat16)             # (nxp, nzp) inference weights
    xb_p = jnp.pad(x_bias.reshape(1, nx), ((0, 0), (0, nxp - nx)))
    zb_p = jnp.pad(z_bias.reshape(1, nz), ((0, 0), (0, nzp - nz)))
    xin_p = jnp.pad(xin, ((0, 0), (0, nxp - nx))).astype(jnp.bfloat16)

    out_shape = (
        jax.ShapeDtypeStruct((B, nzp), jnp.float32),       # q
        jax.ShapeDtypeStruct((S, B, nzp), jnp.bfloat16),   # samples_z (binary)
        jax.ShapeDtypeStruct((S, B, nxp), jnp.bfloat16),   # ps
        jax.ShapeDtypeStruct((S, B, nxp), jnp.bfloat16),   # xouts (binary)
        jax.ShapeDtypeStruct((G * 8, 128), jnp.float32),   # per-block ELBO partials
    )
    out_specs = (
        pl.BlockSpec((tb, nzp), lambda i, *_: (i, 0)),
        pl.BlockSpec((S, tb, nzp), lambda i, *_: (0, i, 0)),
        pl.BlockSpec((S, tb, nxp), lambda i, *_: (0, i, 0)),
        pl.BlockSpec((S, tb, nxp), lambda i, *_: (0, i, 0)),
        pl.BlockSpec((8, 128), lambda i, *_: (i, 0)),
    )
    base_in_specs = [
        pl.BlockSpec((tb, nxp), lambda i, *_: (i, 0)),      # xin (bf16)
        pl.BlockSpec((nzp, nxp), lambda i, *_: (0, 0)),     # U   (bf16)
        pl.BlockSpec((nxp, nzp), lambda i, *_: (0, 0)),     # U^T (bf16)
        pl.BlockSpec((1, nxp), lambda i, *_: (0, 0)),       # x_bias
        pl.BlockSpec((1, nzp), lambda i, *_: (0, 0)),       # z_bias
    ]
    scratch_shapes = [pltpu.VMEM((S, tb, 1), jnp.float32),  # log q(z_s|x)
                      pltpu.VMEM((S, tb, 1), jnp.float32)]  # log p(x, z_s)

    footprint = _block_footprint_bytes(tb, S, nzp, nxp)
    vmem_limit = int(min(0.9 * vmem_cap, max(32 * 1024 * 1024, 2 * footprint)))
    cparams = pltpu.CompilerParams(
        dimension_semantics=("parallel",),
        vmem_limit_bytes=vmem_limit,
    )

    if on_tpu:
        kernel = functools.partial(_sbn_kernel_hw_prng, nz=nz, nx=nx)
        grid_spec = pltpu.PrefetchScalarGridSpec(
            num_scalar_prefetch=1, grid=(G,),
            in_specs=base_in_specs, out_specs=out_specs,
            scratch_shapes=scratch_shapes)
        seed_arr = jnp.asarray([seed], dtype=jnp.int32)
        args = (seed_arr, xin_p, U_bf, Ut_bf, xb_p, zb_p)
    else:
        # Non-TPU fallback: stream pre-generated int32 random bits.
        kz, kx = jax.random.split(jax.random.PRNGKey(seed))
        rz = lax.bitcast_convert_type(
            jax.random.bits(kz, (S, B, nzp), jnp.uint32), jnp.int32)
        rx = lax.bitcast_convert_type(
            jax.random.bits(kx, (S, B, nxp), jnp.uint32), jnp.int32)
        kernel = functools.partial(_sbn_kernel_host_rng, nz=nz, nx=nx)
        grid_spec = pltpu.PrefetchScalarGridSpec(
            num_scalar_prefetch=0, grid=(G,),
            in_specs=base_in_specs + [
                pl.BlockSpec((S, tb, nzp), lambda i, *_: (0, i, 0)),
                pl.BlockSpec((S, tb, nxp), lambda i, *_: (0, i, 0)),
            ],
            out_specs=out_specs, scratch_shapes=scratch_shapes)
        args = (xin_p, U_bf, Ut_bf, xb_p, zb_p, rz, rx)

    q_p, sz_p, ps_p, xout_p, elbo_parts = pl.pallas_call(
        kernel, out_shape=out_shape, grid_spec=grid_spec,
        compiler_params=cparams)(*args)

    q = q_p[:, :nz]
    samples_z = sz_p[:, :, :nz]
    ps = ps_p[:, :, :nx]
    xouts = xout_p[:, :, :nx]
    full_elbo = jnp.sum(elbo_parts)                # reduce per-block partials
    return q, samples_z, ps, xouts, full_elbo


def _reference_elbo(xin, U, x_bias, z_bias, q, samples_z):
    """Pure-JAX f32 reference for the ELBO (mirrors the kernel math)."""
    logits_z = xin @ U.T + z_bias
    log_q = jax.nn.log_sigmoid(logits_z)
    log_1mq = log_q - logits_z
    term2 = jnp.sum(q * log_q + (1.0 - q) * log_1mq)
    logq_sz = jnp.sum(log_1mq + samples_z * logits_z, axis=2)
    log_pz0 = jax.nn.log_sigmoid(-z_bias)
    logp_z = jnp.sum(log_pz0 + samples_z * z_bias, axis=2)
    logits_x = samples_z @ U + x_bias
    log_p1 = jax.nn.log_sigmoid(logits_x)
    log_p0 = log_p1 - logits_x
    logp_x = jnp.sum(log_p0 + xin * logits_x, axis=2)
    logp = logp_z + logp_x
    lq_max = jnp.max(logq_sz, axis=0, keepdims=True)
    w = jnp.exp(logq_sz - lq_max)
    neg_num = lq_max + jnp.log(jnp.sum(w * (-logp), axis=0, keepdims=True))
    pos_den = lq_max + jnp.log(jnp.sum(w, axis=0, keepdims=True))
    term1 = -jnp.sum(jnp.exp(neg_num - pos_den))
    return term1 - term2


if __name__ == "__main__":
    B, nx, nz, S = 16, 32, 16, 2

    key = jax.random.PRNGKey(0)
    k_u, k_xb, k_zb, k_x = jax.random.split(key, 4)

    # Deterministic parameter init matching SBN.__init__ (uniform in +-range).
    wr = float(np.sqrt(6.0 / (nx + nz)))
    U = jax.random.uniform(k_u, (nz, nx), jnp.float32, -wr, wr)
    xr = float(np.sqrt(6.0 / nx))
    x_bias = jax.random.uniform(k_xb, (nx,), jnp.float32, -xr, xr)
    zr = float(np.sqrt(6.0 / nz))
    z_bias = jax.random.uniform(k_zb, (nz,), jnp.float32, -zr, zr)

    # Binary input data (as an SBN expects).
    xin = (jax.random.uniform(k_x, (B, nx)) < 0.5).astype(jnp.float32)

    q, samples_z, ps, xouts, elbo = sbn_forward(
        xin, U, x_bias, z_bias, S=S, seed=0, tb=8)
    jax.block_until_ready((q, samples_z, ps, xouts, elbo))

    assert q.shape == (B, nz)
    assert samples_z.shape == (S, B, nz)
    assert ps.shape == (S, B, nx)
    assert xouts.shape == (S, B, nx)
    assert bool(jnp.all((q > 0.0) & (q < 1.0)))
    assert bool(jnp.all((ps >= 0.0) & (ps <= 1.0)))           # ps stored as bf16
    assert bool(jnp.all((samples_z == 0.0) | (samples_z == 1.0)))
    assert bool(jnp.all((xouts == 0.0) | (xouts == 1.0)))
    assert bool(jnp.isfinite(elbo))

    # Cross-check against a pure-JAX f32 reference (bf16 matmul tolerance).
    q_ref = jnp.clip(jax.nn.sigmoid(xin @ U.T + z_bias), EPS, 1.0 - EPS)
    np.testing.assert_allclose(np.asarray(q), np.asarray(q_ref), atol=2e-2)

    z_f = samples_z.astype(jnp.float32)
    ps_ref = jnp.clip(jax.nn.sigmoid(z_f @ U + x_bias), EPS, 1.0 - EPS)
    np.testing.assert_allclose(np.asarray(ps.astype(jnp.float32)),
                               np.asarray(ps_ref), atol=2e-2)

    elbo_ref = _reference_elbo(xin, U, x_bias, z_bias, q, z_f)
    np.testing.assert_allclose(float(elbo), float(elbo_ref), rtol=0.1, atol=10.0)

    print("KERNEL_OK")
</pallas_src>

<mosaic_0001>
module attributes {stable_mosaic.version = 11 : i64} {
  func.func @_sbn_kernel_host_rng(%arg0: i32, %arg1: memref<8x128xbf16, #tpu.memory_space<vmem>>, %arg2: memref<128x128xbf16, #tpu.memory_space<vmem>>, %arg3: memref<128x128xbf16, #tpu.memory_space<vmem>>, %arg4: memref<1x128xf32, #tpu.memory_space<vmem>>, %arg5: memref<1x128xf32, #tpu.memory_space<vmem>>, %arg6: memref<2x8x128xi32, #tpu.memory_space<vmem>>, %arg7: memref<2x8x128xi32, #tpu.memory_space<vmem>>, %arg8: memref<8x128xf32, #tpu.memory_space<vmem>>, %arg9: memref<2x8x128xbf16, #tpu.memory_space<vmem>>, %arg10: memref<2x8x128xbf16, #tpu.memory_space<vmem>>, %arg11: memref<2x8x128xbf16, #tpu.memory_space<vmem>>, %arg12: memref<8x128xf32, #tpu.memory_space<vmem>>, %arg13: memref<2x8x1xf32, #tpu.memory_space<vmem>>, %arg14: memref<2x8x1xf32, #tpu.memory_space<vmem>>) attributes {dimension_semantics = [#tpu.dimension_semantics<parallel>], iteration_bounds = array<i64: 2>, scalar_prefetch = 0 : i64, scratch_operands = 2 : i64, tpu.core_type = #tpu.core_type<tc>, window_params = [{transform_indices = @transform_0, window_bounds = array<i64: 8, 128>}, {pipeline_mode = #tpu.pipeline_mode<synchronous>, transform_indices = @transform_1, window_bounds = array<i64: 128, 128>}, {pipeline_mode = #tpu.pipeline_mode<synchronous>, transform_indices = @transform_2, window_bounds = array<i64: 128, 128>}, {pipeline_mode = #tpu.pipeline_mode<synchronous>, transform_indices = @transform_3, window_bounds = array<i64: 1, 128>}, {pipeline_mode = #tpu.pipeline_mode<synchronous>, transform_indices = @transform_4, window_bounds = array<i64: 1, 128>}, {transform_indices = @transform_5, window_bounds = array<i64: 2, 8, 128>}, {transform_indices = @transform_6, window_bounds = array<i64: 2, 8, 128>}, {transform_indices = @transform_7, window_bounds = array<i64: 8, 128>}, {transform_indices = @transform_8, window_bounds = array<i64: 2, 8, 128>}, {transform_indices = @transform_9, window_bounds = array<i64: 2, 8, 128>}, {transform_indices = @transform_10, window_bounds = array<i64: 2, 8, 128>}, {transform_indices = @transform_11, window_bounds = array<i64: 8, 128>}]} {
    %c0 = arith.constant 0 : index
    %c0_0 = arith.constant 0 : index
    %0 = vector.load %arg1[%c0, %c0_0] : memref<8x128xbf16, #tpu.memory_space<vmem>>, vector<8x128xbf16>
    %1 = arith.extf %0 : vector<8x128xbf16> to vector<8x128xf32>
    %c0_1 = arith.constant 0 : index
    %c0_2 = arith.constant 0 : index
    %2 = vector.load %arg2[%c0_1, %c0_2] : memref<128x128xbf16, #tpu.memory_space<vmem>>, vector<128x128xbf16>
    %c0_3 = arith.constant 0 : index
    %c0_4 = arith.constant 0 : index
    %3 = vector.load %arg3[%c0_3, %c0_4] : memref<128x128xbf16, #tpu.memory_space<vmem>>, vector<128x128xbf16>
    %c0_5 = arith.constant 0 : index
    %c0_6 = arith.constant 0 : index
    %4 = vector.load %arg4[%c0_5, %c0_6] : memref<1x128xf32, #tpu.memory_space<vmem>>, vector<1x128xf32>
    %c0_7 = arith.constant 0 : index
    %c0_8 = arith.constant 0 : index
    %5 = vector.load %arg5[%c0_7, %c0_8] : memref<1x128xf32, #tpu.memory_space<vmem>>, vector<1x128xf32>
    %6 = tpu.iota {dimensions = array<i32: 1>} : vector<1x128xi32>
    %c16_i32 = arith.constant 16 : i32
    %7 = vector.broadcast %c16_i32 : i32 to vector<1x128xi32>
    %8 = arith.cmpi slt, %6, %7 : vector<1x128xi32>
    %9 = arith.extui %8 : vector<1x128xi1> to vector<1x128xi32>
    %10 = arith.sitofp %9 : vector<1x128xi32> to vector<1x128xf32>
    %11 = tpu.iota {dimensions = array<i32: 1>} : vector<1x128xi32>
    %c32_i32 = arith.constant 32 : i32
    %12 = vector.broadcast %c32_i32 : i32 to vector<1x128xi32>
    %13 = arith.cmpi slt, %11, %12 : vector<1x128xi32>
    %14 = arith.extui %13 : vector<1x128xi1> to vector<1x128xi32>
    %15 = arith.sitofp %14 : vector<1x128xi32> to vector<1x128xf32>
    %cst = arith.constant dense<0.000000e+00> : vector<8x128xf32>
    %16 = tpu.matmul %0, %3, %cst {dimension_numbers = #tpu.dot_dimension_numbers<[1], [0], [0], [1], [0, 0, 1, 1], [], []>} : vector<8x128xbf16>, vector<128x128xbf16>, vector<8x128xf32> -> vector<8x128xf32>
    %17 = vector.broadcast %5 : vector<1x128xf32> to vector<8x128xf32>
    %18 = arith.addf %16, %17 : vector<8x128xf32>
    %19 = math.absf %18 : vector<8x128xf32>
    %cst_9 = arith.constant 0.000000e+00 : f32
    %20 = vector.broadcast %cst_9 : f32 to vector<8x128xf32>
    %21 = arith.subf %20, %19 : vector<8x128xf32>
    %22 = math.exp %21 : vector<8x128xf32>
    %cst_10 = arith.constant 1.000000e+00 : f32
    %23 = vector.broadcast %cst_10 : f32 to vector<8x128xf32>
    %24 = arith.addf %23, %22 : vector<8x128xf32>
    %25 = math.log %24 : vector<8x128xf32>
    %cst_11 = arith.constant 0.000000e+00 : f32
    %26 = vector.broadcast %cst_11 : f32 to vector<8x128xf32>
    %27 = arith.minimumf %18, %26 : vector<8x128xf32>
    %28 = arith.subf %27, %25 : vector<8x128xf32>
    %29 = arith.subf %28, %18 : vector<8x128xf32>
    %cst_12 = arith.constant 1.000000e+00 : f32
    %30 = vector.broadcast %cst_12 : f32 to vector<8x128xf32>
    %31 = arith.divf %30, %24 : vector<8x128xf32>
    %cst_13 = arith.constant 0.000000e+00 : f32
    %32 = vector.broadcast %cst_13 : f32 to vector<8x128xf32>
    %33 = arith.cmpf oge, %18, %32 : vector<8x128xf32>
    %34 = arith.mulf %22, %31 : vector<8x128xf32>
    %35 = arith.select %33, %31, %34 : vector<8x128xi1>, vector<8x128xf32>
    %cst_14 = arith.constant 9.99999997E-7 : f32
    %cst_15 = arith.constant 0.999998986 : f32
    %36 = vector.broadcast %cst_14 : f32 to vector<8x128xf32>
    %37 = arith.maximumf %36, %35 : vector<8x128xf32>
    %38 = vector.broadcast %cst_15 : f32 to vector<8x128xf32>
    %39 = arith.minimumf %38, %37 : vector<8x128xf32>
    %c0_16 = arith.constant 0 : index
    %c0_17 = arith.constant 0 : index
    %40 = vector.load %arg8[%c0_16, %c0_17] : memref<8x128xf32, #tpu.memory_space<vmem>>, vector<8x128xf32>
    tpu.vector_store %arg8[%c0_16, %c0_17], %39 {strides = array<i32>} : memref<8x128xf32, #tpu.memory_space<vmem>>, vector<8x128xf32>,
    %41 = arith.mulf %39, %28 : vector<8x128xf32>
    %cst_18 = arith.constant 1.000000e+00 : f32
    %42 = vector.broadcast %cst_18 : f32 to vector<8x128xf32>
    %43 = arith.subf %42, %39 : vector<8x128xf32>
    %44 = arith.mulf %43, %29 : vector<8x128xf32>
    %45 = arith.addf %41, %44 : vector<8x128xf32>
    %46 = vector.broadcast %10 : vector<1x128xf32> to vector<8x128xf32>
    %47 = arith.mulf %45, %46 : vector<8x128xf32>
    %48 = vector.shape_cast %47 : vector<8x128xf32> to vector<1x8x128xf32>
    %cst_19 = arith.constant dense<0.000000e+00> : vector<1xf32>
    %49 = vector.multi_reduction <add>, %48, %cst_19 [1, 2] : vector<1x8x128xf32> to vector<1xf32>
    %50 = vector.shape_cast %49 : vector<1xf32> to vector<1x1x1xf32>
    %51 = vector.extract %50[0, 0, 0] : f32 from vector<1x1x1xf32>
    %cst_20 = arith.constant 5.000000e-01 : f32
    %52 = vector.broadcast %cst_20 : f32 to vector<8x128xf32>
    %53 = arith.subf %39, %52 : vector<8x128xf32>
    %cst_21 = arith.constant 4.2949673E+9 : f32
    %54 = vector.broadcast %cst_21 : f32 to vector<8x128xf32>
    %55 = arith.mulf %53, %54 : vector<8x128xf32>
    %56 = arith.fptosi %55 : vector<8x128xf32> to vector<8x128xi32>
    %cst_22 = arith.constant 0.000000e+00 : f32
    %57 = vector.broadcast %cst_22 : f32 to vector<1x128xf32>
    %58 = arith.subf %57, %5 : vector<1x128xf32>
    %cst_23 = arith.constant 0.000000e+00 : f32
    %59 = vector.broadcast %cst_23 : f32 to vector<1x128xf32>
    %60 = arith.minimumf %58, %59 : vector<1x128xf32>
    %61 = math.absf %5 : vector<1x128xf32>
    %cst_24 = arith.constant 0.000000e+00 : f32
    %62 = vector.broadcast %cst_24 : f32 to vector<1x128xf32>
    %63 = arith.subf %62, %61 : vector<1x128xf32>
    %64 = math.exp %63 : vector<1x128xf32>
    %cst_25 = arith.constant 1.000000e+00 : f32
    %65 = vector.broadcast %cst_25 : f32 to vector<1x128xf32>
    %66 = arith.addf %65, %64 : vector<1x128xf32>
    %67 = math.log %66 : vector<1x128xf32>
    %68 = arith.subf %60, %67 : vector<1x128xf32>
    %c0_i32 = arith.constant 0 : i32
    %69 = arith.index_cast %c0_i32 : i32 to index
    %c0_26 = arith.constant 0 : index
    %c0_27 = arith.constant 0 : index
    %70 = vector.load %arg6[%69, %c0_26, %c0_27] : memref<2x8x128xi32, #tpu.memory_space<vmem>>, vector<1x8x128xi32>
    %71 = vector.shape_cast %70 : vector<1x8x128xi32> to vector<8x128xi32>
    %72 = arith.cmpi slt, %71, %56 : vector<8x128xi32>
    %73 = arith.extui %72 : vector<8x128xi1> to vector<8x128xi32>
    %74 = arith.sitofp %73 : vector<8x128xi32> to vector<8x128xf32>
    %75 = arith.truncf %74 : vector<8x128xf32> to vector<8x128xbf16>
    %76 = arith.extui %72 : vector<8x128xi1> to vector<8x128xi32>
    %77 = arith.sitofp %76 : vector<8x128xi32> to vector<8x128xf32>
    %78 = arith.index_cast %c0_i32 : i32 to index
    %c0_28 = arith.constant 0 : index
    %c0_29 = arith.constant 0 : index
    %79 = vector.load %arg9[%78, %c0_28, %c0_29] : memref<2x8x128xbf16, #tpu.memory_space<vmem>>, vector<1x8x128xbf16>
    %80 = vector.shape_cast %79 : vector<1x8x128xbf16> to vector<8x128xbf16>
    %81 = vector.shape_cast %75 : vector<8x128xbf16> to vector<1x8x128xbf16>
    tpu.vector_store %arg9[%78, %c0_28, %c0_29], %81 {strides = array<i32>} : memref<2x8x128xbf16, #tpu.memory_space<vmem>>, vector<1x8x128xbf16>,
    %82 = arith.mulf %77, %18 : vector<8x128xf32>
    %83 = arith.addf %29, %82 : vector<8x128xf32>
    %84 = vector.broadcast %10 : vector<1x128xf32> to vector<8x128xf32>
    %85 = arith.mulf %83, %84 : vector<8x128xf32>
    %cst_30 = arith.constant dense<0.000000e+00> : vector<8xf32>
    %86 = vector.multi_reduction <add>, %85, %cst_30 [1] : vector<8x128xf32> to vector<8xf32>
    %87 = vector.shape_cast %86 : vector<8xf32> to vector<8x1xf32>
    %88 = vector.broadcast %5 : vector<1x128xf32> to vector<8x128xf32>
    %89 = arith.mulf %77, %88 : vector<8x128xf32>
    %90 = vector.broadcast %68 : vector<1x128xf32> to vector<8x128xf32>
    %91 = arith.addf %90, %89 : vector<8x128xf32>
    %92 = vector.broadcast %10 : vector<1x128xf32> to vector<8x128xf32>
    %93 = arith.mulf %91, %92 : vector<8x128xf32>
    %cst_31 = arith.constant dense<0.000000e+00> : vector<8xf32>
    %94 = vector.multi_reduction <add>, %93, %cst_31 [1] : vector<8x128xf32> to vector<8xf32>
    %95 = vector.shape_cast %94 : vector<8xf32> to vector<8x1xf32>
    %cst_32 = arith.constant dense<0.000000e+00> : vector<8x128xf32>
    %96 = tpu.matmul %75, %2, %cst_32 {dimension_numbers = #tpu.dot_dimension_numbers<[1], [0], [0], [1], [0, 0, 1, 1], [], []>} : vector<8x128xbf16>, vector<128x128xbf16>, vector<8x128xf32> -> vector<8x128xf32>
    %97 = vector.broadcast %4 : vector<1x128xf32> to vector<8x128xf32>
    %98 = arith.addf %96, %97 : vector<8x128xf32>
    %99 = math.absf %98 : vector<8x128xf32>
    %cst_33 = arith.constant 0.000000e+00 : f32
    %100 = vector.broadcast %cst_33 : f32 to vector<8x128xf32>
    %101 = arith.subf %100, %99 : vector<8x128xf32>
    %102 = math.exp %101 : vector<8x128xf32>
    %cst_34 = arith.constant 1.000000e+00 : f32
    %103 = vector.broadcast %cst_34 : f32 to vector<8x128xf32>
    %104 = arith.addf %103, %102 : vector<8x128xf32>
    %105 = math.log %104 : vector<8x128xf32>
    %cst_35 = arith.constant 0.000000e+00 : f32
    %106 = vector.broadcast %cst_35 : f32 to vector<8x128xf32>
    %107 = arith.minimumf %98, %106 : vector<8x128xf32>
    %108 = arith.subf %107, %105 : vector<8x128xf32>
    %109 = arith.subf %108, %98 : vector<8x128xf32>
    %cst_36 = arith.constant 1.000000e+00 : f32
    %110 = vector.broadcast %cst_36 : f32 to vector<8x128xf32>
    %111 = arith.divf %110, %104 : vector<8x128xf32>
    %cst_37 = arith.constant 0.000000e+00 : f32
    %112 = vector.broadcast %cst_37 : f32 to vector<8x128xf32>
    %113 = arith.cmpf oge, %98, %112 : vector<8x128xf32>
    %114 = arith.mulf %102, %111 : vector<8x128xf32>
    %115 = arith.select %113, %111, %114 : vector<8x128xi1>, vector<8x128xf32>
    %cst_38 = arith.constant 9.99999997E-7 : f32
    %cst_39 = arith.constant 0.999998986 : f32
    %116 = vector.broadcast %cst_38 : f32 to vector<8x128xf32>
    %117 = arith.maximumf %116, %115 : vector<8x128xf32>
    %118 = vector.broadcast %cst_39 : f32 to vector<8x128xf32>
    %119 = arith.minimumf %118, %117 : vector<8x128xf32>
    %120 = arith.truncf %119 : vector<8x128xf32> to vector<8x128xbf16>
    %121 = arith.index_cast %c0_i32 : i32 to index
    %c0_40 = arith.constant 0 : index
    %c0_41 = arith.constant 0 : index
    %122 = vector.load %arg10[%121, %c0_40, %c0_41] : memref<2x8x128xbf16, #tpu.memory_space<vmem>>, vector<1x8x128xbf16>
    %123 = vector.shape_cast %122 : vector<1x8x128xbf16> to vector<8x128xbf16>
    %124 = vector.shape_cast %120 : vector<8x128xbf16> to vector<1x8x128xbf16>
    tpu.vector_store %arg10[%121, %c0_40, %c0_41], %124 {strides = array<i32>} : memref<2x8x128xbf16, #tpu.memory_space<vmem>>, vector<1x8x128xbf16>,
    %cst_42 = arith.constant 5.000000e-01 : f32
    %125 = vector.broadcast %cst_42 : f32 to vector<8x128xf32>
    %126 = arith.subf %119, %125 : vector<8x128xf32>
    %cst_43 = arith.constant 4.2949673E+9 : f32
    %127 = vector.broadcast %cst_43 : f32 to vector<8x128xf32>
    %128 = arith.mulf %126, %127 : vector<8x128xf32>
    %129 = arith.fptosi %128 : vector<8x128xf32> to vector<8x128xi32>
    %130 = arith.index_cast %c0_i32 : i32 to index
    %c0_44 = arith.constant 0 : index
    %c0_45 = arith.constant 0 : index
    %131 = vector.load %arg7[%130, %c0_44, %c0_45] : memref<2x8x128xi32, #tpu.memory_space<vmem>>, vector<1x8x128xi32>
    %132 = vector.shape_cast %131 : vector<1x8x128xi32> to vector<8x128xi32>
    %133 = arith.cmpi slt, %132, %129 : vector<8x128xi32>
    %134 = arith.extui %133 : vector<8x128xi1> to vector<8x128xi32>
    %135 = arith.sitofp %134 : vector<8x128xi32> to vector<8x128xf32>
    %136 = arith.truncf %135 : vector<8x128xf32> to vector<8x128xbf16>
    %137 = arith.index_cast %c0_i32 : i32 to index
    %c0_46 = arith.constant 0 : index
    %c0_47 = arith.constant 0 : index
    %138 = vector.load %arg11[%137, %c0_46, %c0_47] : memref<2x8x128xbf16, #tpu.memory_space<vmem>>, vector<1x8x128xbf16>
    %139 = vector.shape_cast %138 : vector<1x8x128xbf16> to vector<8x128xbf16>
    %140 = vector.shape_cast %136 : vector<8x128xbf16> to vector<1x8x128xbf16>
    tpu.vector_store %arg11[%137, %c0_46, %c0_47], %140 {strides = array<i32>} : memref<2x8x128xbf16, #tpu.memory_space<vmem>>, vector<1x8x128xbf16>,
    %141 = arith.mulf %1, %98 : vector<8x128xf32>
    %142 = arith.addf %109, %141 : vector<8x128xf32>
    %143 = vector.broadcast %15 : vector<1x128xf32> to vector<8x128xf32>
    %144 = arith.mulf %142, %143 : vector<8x128xf32>
    %cst_48 = arith.constant dense<0.000000e+00> : vector<8xf32>
    %145 = vector.multi_reduction <add>, %144, %cst_48 [1] : vector<8x128xf32> to vector<8xf32>
    %146 = vector.shape_cast %145 : vector<8xf32> to vector<8x1xf32>
    %147 = arith.index_cast %c0_i32 : i32 to index
    %c0_49 = arith.constant 0 : index
    %c0_50 = arith.constant 0 : index
    %148 = vector.load %arg13[%147, %c0_49, %c0_50] : memref<2x8x1xf32, #tpu.memory_space<vmem>>, vector<1x8x1xf32>
    %149 = vector.shape_cast %148 : vector<1x8x1xf32> to vector<8x1xf32>
    %150 = vector.shape_cast %87 : vector<8x1xf32> to vector<1x8x1xf32>
    tpu.vector_store %arg13[%147, %c0_49, %c0_50], %150 {strides = array<i32>} : memref<2x8x1xf32, #tpu.memory_space<vmem>>, vector<1x8x1xf32>,
    %151 = arith.addf %95, %146 : vector<8x1xf32>
    %152 = arith.index_cast %c0_i32 : i32 to index
    %c0_51 = arith.constant 0 : index
    %c0_52 = arith.constant 0 : index
    %153 = vector.load %arg14[%152, %c0_51, %c0_52] : memref<2x8x1xf32, #tpu.memory_space<vmem>>, vector<1x8x1xf32>
    %154 = vector.shape_cast %153 : vector<1x8x1xf32> to vector<8x1xf32>
    %155 = vector.shape_cast %151 : vector<8x1xf32> to vector<1x8x1xf32>
    tpu.vector_store %arg14[%152, %c0_51, %c0_52], %155 {strides = array<i32>} : memref<2x8x1xf32, #tpu.memory_space<vmem>>, vector<1x8x1xf32>,
    %c1_i32 = arith.constant 1 : i32
    %156 = arith.index_cast %c1_i32 : i32 to index
    %c0_53 = arith.constant 0 : index
    %c0_54 = arith.constant 0 : index
    %157 = vector.load %arg6[%156, %c0_53, %c0_54] : memref<2x8x128xi32, #tpu.memory_space<vmem>>, vector<1x8x128xi32>
    %158 = vector.shape_cast %157 : vector<1x8x128xi32> to vector<8x128xi32>
    %159 = arith.cmpi slt, %158, %56 : vector<8x128xi32>
    %160 = arith.extui %159 : vector<8x128xi1> to vector<8x128xi32>
    %161 = arith.sitofp %160 : vector<8x128xi32> to vector<8x128xf32>
    %162 = arith.truncf %161 : vector<8x128xf32> to vector<8x128xbf16>
    %163 = arith.extui %159 : vector<8x128xi1> to vector<8x128xi32>
    %164 = arith.sitofp %163 : vector<8x128xi32> to vector<8x128xf32>
    %165 = arith.index_cast %c1_i32 : i32 to index
    %c0_55 = arith.constant 0 : index
    %c0_56 = arith.constant 0 : index
    %166 = vector.load %arg9[%165, %c0_55, %c0_56] : memref<2x8x128xbf16, #tpu.memory_space<vmem>>, vector<1x8x128xbf16>
    %167 = vector.shape_cast %166 : vector<1x8x128xbf16> to vector<8x128xbf16>
    %168 = vector.shape_cast %162 : vector<8x128xbf16> to vector<1x8x128xbf16>
    tpu.vector_store %arg9[%165, %c0_55, %c0_56], %168 {strides = array<i32>} : memref<2x8x128xbf16, #tpu.memory_space<vmem>>, vector<1x8x128xbf16>,
    %169 = arith.mulf %164, %18 : vector<8x128xf32>
    %170 = arith.addf %29, %169 : vector<8x128xf32>
    %171 = vector.broadcast %10 : vector<1x128xf32> to vector<8x128xf32>
    %172 = arith.mulf %170, %171 : vector<8x128xf32>
    %cst_57 = arith.constant dense<0.000000e+00> : vector<8xf32>
    %173 = vector.multi_reduction <add>, %172, %cst_57 [1] : vector<8x128xf32> to vector<8xf32>
    %174 = vector.shape_cast %173 : vector<8xf32> to vector<8x1xf32>
    %175 = vector.broadcast %5 : vector<1x128xf32> to vector<8x128xf32>
    %176 = arith.mulf %164, %175 : vector<8x128xf32>
    %177 = vector.broadcast %68 : vector<1x128xf32> to vector<8x128xf32>
    %178 = arith.addf %177, %176 : vector<8x128xf32>
    %179 = vector.broadcast %10 : vector<1x128xf32> to vector<8x128xf32>
    %180 = arith.mulf %178, %179 : vector<8x128xf32>
    %cst_58 = arith.constant dense<0.000000e+00> : vector<8xf32>
    %181 = vector.multi_reduction <add>, %180, %cst_58 [1] : vector<8x128xf32> to vector<8xf32>
    %182 = vector.shape_cast %181 : vector<8xf32> to vector<8x1xf32>
    %cst_59 = arith.constant dense<0.000000e+00> : vector<8x128xf32>
    %183 = tpu.matmul %162, %2, %cst_59 {dimension_numbers = #tpu.dot_dimension_numbers<[1], [0], [0], [1], [0, 0, 1, 1], [], []>} : vector<8x128xbf16>, vector<128x128xbf16>, vector<8x128xf32> -> vector<8x128xf32>
    %184 = vector.broadcast %4 : vector<1x128xf32> to vector<8x128xf32>
    %185 = arith.addf %183, %184 : vector<8x128xf32>
    %186 = math.absf %185 : vector<8x128xf32>
    %cst_60 = arith.constant 0.000000e+00 : f32
    %187 = vector.broadcast %cst_60 : f32 to vector<8x128xf32>
    %188 = arith.subf %187, %186 : vector<8x128xf32>
    %189 = math.exp %188 : vector<8x128xf32>
    %cst_61 = arith.constant 1.000000e+00 : f32
    %190 = vector.broadcast %cst_61 : f32 to vector<8x128xf32>
    %191 = arith.addf %190, %189 : vector<8x128xf32>
    %192 = math.log %191 : vector<8x128xf32>
    %cst_62 = arith.constant 0.000000e+00 : f32
    %193 = vector.broadcast %cst_62 : f32 to vector<8x128xf32>
    %194 = arith.minimumf %185, %193 : vector<8x128xf32>
    %195 = arith.subf %194, %192 : vector<8x128xf32>
    %196 = arith.subf %195, %185 : vector<8x128xf32>
    %cst_63 = arith.constant 1.000000e+00 : f32
    %197 = vector.broadcast %cst_63 : f32 to vector<8x128xf32>
    %198 = arith.divf %197, %191 : vector<8x128xf32>
    %cst_64 = arith.constant 0.000000e+00 : f32
    %199 = vector.broadcast %cst_64 : f32 to vector<8x128xf32>
    %200 = arith.cmpf oge, %185, %199 : vector<8x128xf32>
    %201 = arith.mulf %189, %198 : vector<8x128xf32>
    %202 = arith.select %200, %198, %201 : vector<8x128xi1>, vector<8x128xf32>
    %cst_65 = arith.constant 9.99999997E-7 : f32
    %cst_66 = arith.constant 0.999998986 : f32
    %203 = vector.broadcast %cst_65 : f32 to vector<8x128xf32>
    %204 = arith.maximumf %203, %202 : vector<8x128xf32>
    %205 = vector.broadcast %cst_66 : f32 to vector<8x128xf32>
    %206 = arith.minimumf %205, %204 : vector<8x128xf32>
    %207 = arith.truncf %206 : vector<8x128xf32> to vector<8x128xbf16>
    %208 = arith.index_cast %c1_i32 : i32 to index
    %c0_67 = arith.constant 0 : index
    %c0_68 = arith.constant 0 : index
    %209 = vector.load %arg10[%208, %c0_67, %c0_68] : memref<2x8x128xbf16, #tpu.memory_space<vmem>>, vector<1x8x128xbf16>
    %210 = vector.shape_cast %209 : vector<1x8x128xbf16> to vector<8x128xbf16>
    %211 = vector.shape_cast %207 : vector<8x128xbf16> to vector<1x8x128xbf16>
    tpu.vector_store %arg10[%208, %c0_67, %c0_68], %211 {strides = array<i32>} : memref<2x8x128xbf16, #tpu.memory_space<vmem>>, vector<1x8x128xbf16>,
    %cst_69 = arith.constant 5.000000e-01 : f32
    %212 = vector.broadcast %cst_69 : f32 to vector<8x128xf32>
    %213 = arith.subf %206, %212 : vector<8x128xf32>
    %cst_70 = arith.constant 4.2949673E+9 : f32
    %214 = vector.broadcast %cst_70 : f32 to vector<8x128xf32>
    %215 = arith.mulf %213, %214 : vector<8x128xf32>
    %216 = arith.fptosi %215 : vector<8x128xf32> to vector<8x128xi32>
    %217 = arith.index_cast %c1_i32 : i32 to index
    %c0_71 = arith.constant 0 : index
    %c0_72 = arith.constant 0 : index
    %218 = vector.load %arg7[%217, %c0_71, %c0_72] : memref<2x8x128xi32, #tpu.memory_space<vmem>>, vector<1x8x128xi32>
    %219 = vector.shape_cast %218 : vector<1x8x128xi32> to vector<8x128xi32>
    %220 = arith.cmpi slt, %219, %216 : vector<8x128xi32>
    %221 = arith.extui %220 : vector<8x128xi1> to vector<8x128xi32>
    %222 = arith.sitofp %221 : vector<8x128xi32> to vector<8x128xf32>
    %223 = arith.truncf %222 : vector<8x128xf32> to vector<8x128xbf16>
    %224 = arith.index_cast %c1_i32 : i32 to index
    %c0_73 = arith.constant 0 : index
    %c0_74 = arith.constant 0 : index
    %225 = vector.load %arg11[%224, %c0_73, %c0_74] : memref<2x8x128xbf16, #tpu.memory_space<vmem>>, vector<1x8x128xbf16>
    %226 = vector.shape_cast %225 : vector<1x8x128xbf16> to vector<8x128xbf16>
    %227 = vector.shape_cast %223 : vector<8x128xbf16> to vector<1x8x128xbf16>
    tpu.vector_store %arg11[%224, %c0_73, %c0_74], %227 {strides = array<i32>} : memref<2x8x128xbf16, #tpu.memory_space<vmem>>, vector<1x8x128xbf16>,
    %228 = arith.mulf %1, %185 : vector<8x128xf32>
    %229 = arith.addf %196, %228 : vector<8x128xf32>
    %230 = vector.broadcast %15 : vector<1x128xf32> to vector<8x128xf32>
    %231 = arith.mulf %229, %230 : vector<8x128xf32>
    %cst_75 = arith.constant dense<0.000000e+00> : vector<8xf32>
    %232 = vector.multi_reduction <add>, %231, %cst_75 [1] : vector<8x128xf32> to vector<8xf32>
    %233 = vector.shape_cast %232 : vector<8xf32> to vector<8x1xf32>
    %234 = arith.index_cast %c1_i32 : i32 to index
    %c0_76 = arith.constant 0 : index
    %c0_77 = arith.constant 0 : index
    %235 = vector.load %arg13[%234, %c0_76, %c0_77] : memref<2x8x1xf32, #tpu.memory_space<vmem>>, vector<1x8x1xf32>
    %236 = vector.shape_cast %235 : vector<1x8x1xf32> to vector<8x1xf32>
    %237 = vector.shape_cast %174 : vector<8x1xf32> to vector<1x8x1xf32>
    tpu.vector_store %arg13[%234, %c0_76, %c0_77], %237 {strides = array<i32>} : memref<2x8x1xf32, #tpu.memory_space<vmem>>, vector<1x8x1xf32>,
    %238 = arith.addf %182, %233 : vector<8x1xf32>
    %239 = arith.index_cast %c1_i32 : i32 to index
    %c0_78 = arith.constant 0 : index
    %c0_79 = arith.constant 0 : index
    %240 = vector.load %arg14[%239, %c0_78, %c0_79] : memref<2x8x1xf32, #tpu.memory_space<vmem>>, vector<1x8x1xf32>
    %241 = vector.shape_cast %240 : vector<1x8x1xf32> to vector<8x1xf32>
    %242 = vector.shape_cast %238 : vector<8x1xf32> to vector<1x8x1xf32>
    tpu.vector_store %arg14[%239, %c0_78, %c0_79], %242 {strides = array<i32>} : memref<2x8x1xf32, #tpu.memory_space<vmem>>, vector<1x8x1xf32>,
    %c2_i32 = arith.constant 2 : i32
    %c0_80 = arith.constant 0 : index
    %c0_81 = arith.constant 0 : index
    %c0_82 = arith.constant 0 : index
    %243 = vector.load %arg13[%c0_80, %c0_81, %c0_82] : memref<2x8x1xf32, #tpu.memory_space<vmem>>, vector<2x8x1xf32>
    %c0_83 = arith.constant 0 : index
    %c0_84 = arith.constant 0 : index
    %c0_85 = arith.constant 0 : index
    %244 = vector.load %arg14[%c0_83, %c0_84, %c0_85] : memref<2x8x1xf32, #tpu.memory_space<vmem>>, vector<2x8x1xf32>
    %cst_86 = arith.constant dense<0xFF800000> : vector<8x1xf32>
    %245 = vector.multi_reduction <maximumf>, %243, %cst_86 [0] : vector<2x8x1xf32> to vector<8x1xf32>
    %246 = vector.shape_cast %245 : vector<8x1xf32> to vector<1x8x1xf32>
    %247 = vector.broadcast %246 : vector<1x8x1xf32> to vector<2x8x1xf32>
    %248 = arith.subf %243, %247 : vector<2x8x1xf32>
    %249 = math.exp %248 : vector<2x8x1xf32>
    %cst_87 = arith.constant 0.000000e+00 : f32
    %250 = vector.broadcast %cst_87 : f32 to vector<2x8x1xf32>
    %251 = arith.subf %250, %244 : vector<2x8x1xf32>
    %cst_88 = arith.constant 1.000000e-30 : f32
    %252 = vector.broadcast %cst_88 : f32 to vector<2x8x1xf32>
    %253 = arith.maximumf %251, %252 : vector<2x8x1xf32>
    %254 = arith.mulf %249, %253 : vector<2x8x1xf32>
    %cst_89 = arith.constant dense<0.000000e+00> : vector<8x1xf32>
    %255 = vector.multi_reduction <add>, %254, %cst_89 [0] : vector<2x8x1xf32> to vector<8x1xf32>
    %256 = vector.shape_cast %255 : vector<8x1xf32> to vector<1x8x1xf32>
    %257 = math.log %256 : vector<1x8x1xf32>
    %258 = arith.addf %246, %257 : vector<1x8x1xf32>
    %cst_90 = arith.constant dense<0.000000e+00> : vector<8x1xf32>
    %259 = vector.multi_reduction <add>, %249, %cst_90 [0] : vector<2x8x1xf32> to vector<8x1xf32>
    %260 = vector.shape_cast %259 : vector<8x1xf32> to vector<1x8x1xf32>
    %261 = math.log %260 : vector<1x8x1xf32>
    %262 = arith.addf %246, %261 : vector<1x8x1xf32>
    %263 = arith.subf %258, %262 : vector<1x8x1xf32>
    %264 = math.exp %263 : vector<1x8x1xf32>
    %265 = vector.shape_cast %264 : vector<1x8x1xf32> to vector<1x1x8x1xf32>
    %cst_91 = arith.constant dense<0.000000e+00> : vector<1xf32>
    %266 = vector.multi_reduction <add>, %265, %cst_91 [1, 2, 3] : vector<1x1x8x1xf32> to vector<1xf32>
    %267 = vector.shape_cast %266 : vector<1xf32> to vector<1x1x1x1xf32>
    %268 = vector.extract %267[0, 0, 0, 0] : f32 from vector<1x1x1x1xf32>
    %cst_92 = arith.constant -1.000000e+00 : f32
    %269 = arith.mulf %cst_92, %268 : f32
    %270 = arith.subf %269, %51 : f32
    %271 = tpu.iota {dimensions = array<i32: 0>} : vector<8x128xi32>
    %272 = tpu.iota {dimensions = array<i32: 1>} : vector<8x128xi32>
    %c0_i32_93 = arith.constant 0 : i32
    %273 = vector.broadcast %c0_i32_93 : i32 to vector<8x128xi32>
    %274 = arith.cmpi eq, %271, %273 : vector<8x128xi32>
    %c0_i32_94 = arith.constant 0 : i32
    %275 = vector.broadcast %c0_i32_94 : i32 to vector<8x128xi32>
    %276 = arith.cmpi eq, %272, %275 : vector<8x128xi32>
    %277 = arith.andi %274, %276 : vector<8x128xi1>
    %cst_95 = arith.constant 0.000000e+00 : f32
    %278 = vector.broadcast %270 : f32 to vector<8x128xf32>
    %279 = vector.broadcast %cst_95 : f32 to vector<8x128xf32>
    %280 = arith.select %277, %278, %279 : vector<8x128xi1>, vector<8x128xf32>
    %c0_96 = arith.constant 0 : index
    %c0_97 = arith.constant 0 : index
    %281 = vector.load %arg12[%c0_96, %c0_97] : memref<8x128xf32, #tpu.memory_space<vmem>>, vector<8x128xf32>
    tpu.vector_store %arg12[%c0_96, %c0_97], %280 {strides = array<i32>} : memref<8x128xf32, #tpu.memory_space<vmem>>, vector<8x128xf32>,
    return
  }
  func.func @transform_0(%arg0: i32) -> (i32, i32) {
    %c0_i32 = arith.constant 0 : i32
    %c0_i32_0 = arith.constant 0 : i32
    return %arg0, %c0_i32 : i32, i32
  }
  func.func @transform_1(%arg0: i32) -> (i32, i32) {
    %c0_i32 = arith.constant 0 : i32
    %c0_i32_0 = arith.constant 0 : i32
    %c0_i32_1 = arith.constant 0 : i32
    return %c0_i32, %c0_i32_0 : i32, i32
  }
  func.func @transform_2(%arg0: i32) -> (i32, i32) {
    %c0_i32 = arith.constant 0 : i32
    %c0_i32_0 = arith.constant 0 : i32
    %c0_i32_1 = arith.constant 0 : i32
    return %c0_i32, %c0_i32_0 : i32, i32
  }
  func.func @transform_3(%arg0: i32) -> (i32, i32) {
    %c0_i32 = arith.constant 0 : i32
    %c0_i32_0 = arith.constant 0 : i32
    %c0_i32_1 = arith.constant 0 : i32
    return %c0_i32, %c0_i32_0 : i32, i32
  }
  func.func @transform_4(%arg0: i32) -> (i32, i32) {
    %c0_i32 = arith.constant 0 : i32
    %c0_i32_0 = arith.constant 0 : i32
    %c0_i32_1 = arith.constant 0 : i32
    return %c0_i32, %c0_i32_0 : i32, i32
  }
  func.func @transform_5(%arg0: i32) -> (i32, i32, i32) {
    %c0_i32 = arith.constant 0 : i32
    %c0_i32_0 = arith.constant 0 : i32
    %c0_i32_1 = arith.constant 0 : i32
    return %c0_i32, %arg0, %c0_i32_0 : i32, i32, i32
  }
  func.func @transform_6(%arg0: i32) -> (i32, i32, i32) {
    %c0_i32 = arith.constant 0 : i32
    %c0_i32_0 = arith.constant 0 : i32
    %c0_i32_1 = arith.constant 0 : i32
    return %c0_i32, %arg0, %c0_i32_0 : i32, i32, i32
  }
  func.func @transform_7(%arg0: i32) -> (i32, i32) {
    %c0_i32 = arith.constant 0 : i32
    %c0_i32_0 = arith.constant 0 : i32
    return %arg0, %c0_i32 : i32, i32
  }
  func.func @transform_8(%arg0: i32) -> (i32, i32, i32) {
    %c0_i32 = arith.constant 0 : i32
    %c0_i32_0 = arith.constant 0 : i32
    %c0_i32_1 = arith.constant 0 : i32
    return %c0_i32, %arg0, %c0_i32_0 : i32, i32, i32
  }
  func.func @transform_9(%arg0: i32) -> (i32, i32, i32) {
    %c0_i32 = arith.constant 0 : i32
    %c0_i32_0 = arith.constant 0 : i32
    %c0_i32_1 = arith.constant 0 : i32
    return %c0_i32, %arg0, %c0_i32_0 : i32, i32, i32
  }
  func.func @transform_10(%arg0: i32) -> (i32, i32, i32) {
    %c0_i32 = arith.constant 0 : i32
    %c0_i32_0 = arith.constant 0 : i32
    %c0_i32_1 = arith.constant 0 : i32
    return %c0_i32, %arg0, %c0_i32_0 : i32, i32, i32
  }
  func.func @transform_11(%arg0: i32) -> (i32, i32) {
    %c0_i32 = arith.constant 0 : i32
    %c0_i32_0 = arith.constant 0 : i32
    return %arg0, %c0_i32 : i32, i32
  }
}

</mosaic_0001>

<bundles_post_ra>
// kernel: tpu_custom_call.1
= control target key start
LH: loop header
LB: loop body
LE: loop exit
PB: predicated region body
PF: predicated region fallthrough
CT: control target
= control target key end

     0   :  { %s2688_s0 = inlined_call_operand.hbm [shape: bf16[16,128], index: 0, kind: input, shape index: {}]   ;;  %s2689_s1 = inlined_call_operand.hbm [shape: bf16[128,128], index: 1, kind: input, shape index: {}]   ;;  %s2690_s2 = inlined_call_operand.hbm [shape: bf16[128,128], index: 2, kind: input, shape index: {}]   ;;  %s2691_s3 = inlined_call_operand.vmem [shape: f32[1,128], index: 3, kind: input, shape index: {}]   ;;  %s2692_s4 = inlined_call_operand.vmem [shape: f32[1,128], index: 4, kind: input, shape index: {}]   ;;  %s2693_s5 = inlined_call_operand.hbm [shape: s32[2,16,128], index: 5, kind: input, shape index: {}]   ;;  %s2694_s6 = inlined_call_operand.hbm [shape: s32[2,16,128], index: 6, kind: input, shape index: {}]   ;;  %s2695_s7 = inlined_call_operand.hbm [shape: f32[16,128], index: 7, kind: output, shape index: {0}]   ;;  %s2696_s8 = inlined_call_operand.hbm [shape: bf16[2,16,128], index: 8, kind: output, shape index: {1}]   ;;  %s2697_s9 = inlined_call_operand.hbm [shape: bf16[2,16,128], index: 9, kind: output, shape index: {2}]   ;;  %s2698_s10 = inlined_call_operand.hbm [shape: bf16[2,16,128], index: 10, kind: output, shape index: {3}]   ;;  %s2699_s11 = inlined_call_operand.hbm [shape: f32[16,128], index: 11, kind: output, shape index: {4}]  }
   0x1   :  { %2731 = sst [smem:[#allocation33_spill]] %s2688_s0 }
   0x2   :  { %2732 = sst [smem:[#allocation34_spill]] %s2689_s1 }
   0x3   :  { %2733 = sst [smem:[#allocation35_spill]] %s2691_s3 }
   0x4   :  { %2734 = sst [smem:[#allocation36_spill]] %s2692_s4 }
   0x5   :  { %2735 = sst [smem:[#allocation37_spill]] %s2693_s5 }
   0x6   :  { %2736 = sst [smem:[#allocation38_spill]] %s2695_s7 }
   0x7   :  { %2737 = sst [smem:[#allocation39_spill]] %s2696_s8 }
   0x8   :  { %2738 = sst [smem:[#allocation40_spill]] %s2697_s9 }
   0x9   :  { %2739 = sst [smem:[#allocation41_spill]] %s2698_s10 }
   0xa   :  { %2740 = sst [smem:[#allocation42_spill]] %s2699_s11 }
   0xb   :  { %17 = vsyncpa [#allocation5], 0 }
   0xc   :  { %19 = vsyncpa [#allocation5 + $0x1], 0 }
   0xd   :  { %20 = vsyncpa [#allocation8], 0 }
   0xe   :  { %21 = vsyncpa [#allocation11], 0 }
   0xf   :  { %23 = vsyncpa [#allocation11 + $0x1], 0 }
  0x10   :  { %24 = vsyncpa [#allocation6], 0 }
  0x11   :  { %26 = vsyncpa [#allocation6 + $0x1], 0 }
  0x12   :  { %27 = vsyncpa [#allocation15], 0 }
  0x13   :  { %29 = vsyncpa [#allocation15 + $0x1], 0 }
  0x14   :  { %30 = vsyncpa [#allocation18], 0 }
  0x15   :  { %32 = vsyncpa [#allocation18 + $0x1], 0  ;;  %s2122_s17 = smov 0   ;;  %s2124_s18 = smov 0  }
  0x16   :  { %s2126_s19 = smov 0   ;;  %s2128_s20 = smov 0  }
  0x17 LB: > { %2741 = sst [smem:[#allocation26_spill]] %s2027_s17  ;;  %s2143_s21 = sadd.s32 4294967295, %s2039_s20   ;;  %s2039_s20 = sphi %s2128_s20, %s2791_s20   ;;  %s2035_s19 = sphi %s2126_s19, %s2793_s19   ;;  %s2031_s18 = sphi %s2124_s18, %s2795_s18   ;;  %s2027_s17 = sphi %s2122_s17, %s2794_s17  }
  0x18   : > { %2742 = sst [smem:[#allocation27_spill]] %s2035_s19  ;;  %s2700_s22 = sadd.s32 4294967294, %s2039_s20  }
  0x19   : > { %2743 = sst [smem:[#allocation28_spill]] %s2143_s21  ;;  %s2147_s23 = sadd.s32 1, %s2039_s20  }
  0x1a   : > { %2744 = sst [smem:[#allocation29_spill]] %s2147_s23  ;;  %s45_s24 = sadd.s32 1, %s2035_s19 }
  0x1b   : > { %s42_s25 = ssub.s32 %s2039_s20, %s2147_s23  ;;  %p52_p0 = scmp.ne.s32.totalorder %s2035_s19, %s2031_s18 }
  0x1c   : > { %p43_p1 = scmp.eq.s32.totalorder %s42_s25, 0  ;;  %p53_p2 = scmp.eq.s32.totalorder %s2039_s20, 0 }
  0x1d   : > { %p58_p3 = scmp.ne.s32.totalorder %s2031_s18, %s2027_s17  ;;  %p2706_p4 = scmp.eq.s32.totalorder %s2143_s21, 0 }
  0x1e   : > { %s2159_s26 = scalar_select %p43_p1, %s2035_s19, %s45_s24  }
  0x1f   : > { %p2161_p5 = por %p53_p2, %p52_p0  ;;  %p2167_p6 = por %p2706_p4, %p58_p3 }
  0x20   : > { %2745 = sst [smem:[#allocation30_spill]] %s2159_s26  ;;  %p218_p7 = scmp.eq.s32.totalorder %s2143_s21, 1 }
  0x21   : > { %s2746_s27 = scalar_select %p2161_p5, 1, 0 }
  0x22   : > { %s2747_s28 = scalar_select %p2167_p6, 1, 0 }
  0x23   : > { %p224_p8 = scmp.eq.s32.totalorder %s2700_s22, 1  ;;  %p1378_p9 = scmp.ge.s32.totalorder %s2039_s20, 1 }
  0x24   : > { %p335_p10 = scmp.lt.s32.totalorder %s2039_s20, 3  ;;  %p2176_p11 = por %p218_p7, %p52_p0 }
  0x25   : > { %p2180_p12 = por %p224_p8, %p58_p3  ;;  %s2041_s13 = smov [#allocation7]  }
  0x26   : > { %s2748_s29 = scalar_select %p2176_p11, 1, 0 }
  0x27   : > { %s2750_s30 = scalar_select %p2180_p12, 1, 0 }
  0x28   : > { %2749 = sst [smem:[#allocation31_spill]] %s2748_s29  ;;  %p2184_p13 = pnand %p1378_p9, %p335_p10 }
  0x29   : > { %2751 = sst [smem:[#allocation32_spill]] %s2750_s30  ;;  %s347_s14 = sshll.u32 %s2041_s13, 4  ;;  %s348_s14 = int_to_ptr.vmem [resolvable:$true] %s347_s14 }
  0x2a   : > { %s2752_s12 = scalar_select %p2184_p13, 1, 0 }
  0x2b   : > { %p1567_p1 = pneg %p2184_p13  ;;  %s2199_s16 = sand.u32 1, %s2035_s19  }
  0x2c   : > { %s398_s24 = sand.u32 1, %s2039_s20   ;;  %s2754_s1 = sld [smem:[#allocation34_spill]] }
  0x2d   : > { %p2192_p2 = pnand %p1567_p1, %p2706_p4 }
  0x2f   : > { %s2753_s15 = scalar_select %p2192_p2, 1, 0 }
  0x30   : > { %p2715_p8 = pneg %p2192_p2 }
  0x32   : > { %s1699_s26 = scalar_lea.hbm %s2754_s1, 1024 }
  0x33   : > { %p1700_p7 = scmp.ne.s32.totalorder %s2754_s1, %s1699_s26  ;;  %p1706_p1 = scmp.lt.u32.totalorder %s1699_s26, %s2754_s1 }
  0x35   : > { %p1702_p9 = pnand %p2715_p8, %p1700_p7 }
  0x37   : > { %p1703_p10 = pneg %p1702_p9 }
  0x39   : > { %p1708_p0 = pnand %p1706_p1, %p1703_p10 }
  0x3b   : > { %1711 = shalt.err (!%p1708_p0)
}
  0x3c   : > { %s1712_s19 = scalar_lea.vmem %s348_s14, 1024  ;;  %p1720_p11 = scmp.lt.s32.totalorder %s348_s14, %s348_s14 }
  0x3d   : > { %p1713_p4 = scmp.ne.s32.totalorder %s348_s14, %s1712_s19  ;;  %p1721_p6 = scmp.lt.s32.totalorder %s1712_s19, %s1712_s19 }
  0x3f   : > { %p1715_p3 = pnand %p1713_p4, %p2715_p8  ;;  %p1722_p13 = por %p1721_p6, %p1720_p11 }
  0x41   : > { %p1716_p12 = pneg %p1715_p3 }
  0x43   : > { %p1723_p5 = pnand %p1722_p13, %p1716_p12 }
  0x45   : > { %1726 = shalt.err (!%p1723_p5)
}
  0x46   : > { %s2712_s22 = smov 64   ;;  %s2713_s17 = smov 4  }
  0x47   : > { %1570 = dma.hbm_to_vmem [thread:$0]  (!%p2192_p2), %s2754_s1, 1024, %s348_s14, [#allocation8], %s2712_s22, %s2712_s22, %s2713_s17  }
  0x48   : > { %p2755_p4 = scmp.ne.s32.totalorder %s2746_s27, 0  ;;  %p2756_p6 = scmp.lt.s32.totalorder %s2039_s20, 2 }
  0x49   : > { %s2714_s30 = sshll.u32 %s2199_s16, 4  ;;  %s1385_s25 = sshll.u32 %s2039_s20, 7 }
  0x4a   : > { %p2231_p5 = pnand %p2756_p6, %p2755_p4  ;;  %s2758_s5 = sld [smem:[#allocation37_spill]] }
  0x4b   : > { %s402_s27 = scalar_lea.vmem [#allocation10], %s2714_s30  ;;  %s2248_s23 = scalar_lea.sflag [#allocation11], %s398_s24 }
  0x4c   : > { %s2757_s19 = scalar_select %p2231_p5, 1, 0 }
  0x4d   : > { %s408_s14 = sshll.u32 %s402_s27, 4  ;;  %p2254_p12 = pneg %p2231_p5  ;;  %s2246_s14 = int_to_ptr.vmem [resolvable:$true] %s408_s14 }
  0x4f   : > { %s2759_s22 = scalar_select %p2254_p12, 1, 0 }
  0x50   : > { %s2242_s7 = scalar_lea.hbm %s2758_s5, %s1385_s25  ;;  %s1732_s17 = scalar_lea.hbm %s2758_s5, 512 }
  0x51   : > { %s1727_s26 = scalar_lea.hbm %s2242_s7, 256  ;;  %p1733_p3 = scmp.lt.u32.totalorder %s2242_s7, %s2758_s5 }
  0x52   : > { %p1728_p11 = scmp.ne.s32.totalorder %s2242_s7, %s1727_s26  ;;  %p1734_p7 = scmp.lt.u32.totalorder %s1732_s17, %s1727_s26 }
  0x53   : > { %p1736_p10 = scmp.lt.u32.totalorder %s1727_s26, %s2242_s7 }
  0x54   : > { %p1730_p13 = pnand %p2254_p12, %p1728_p11  ;;  %p1735_p9 = por %p1734_p7, %p1733_p3 }
  0x56   : > { %p1731_p0 = pneg %p1730_p13  ;;  %p1737_p1 = por %p1736_p10, %p1735_p9 }
  0x58   : > { %p1738_p4 = pnand %p1737_p1, %p1731_p0 }
  0x5a   : > { %1741 = shalt.err (!%p1738_p4)
}
  0x5b   : > { %s1742_s24 = scalar_lea.vmem %s2246_s14, 256  ;;  %s2044_s11 = smov [#allocation10]  }
  0x5c   : > { %p1743_p6 = scmp.ne.s32.totalorder %s2246_s14, %s1742_s24  ;;  %s1747_s13 = sshll.u32 %s2044_s11, 4  ;;  %s1748_s13 = int_to_ptr.vmem [resolvable:$false] %s1747_s13 }
  0x5d   : > { %s1749_s30 = scalar_lea.vmem %s1748_s13, 512  ;;  %p1750_p8 = scmp.lt.s32.totalorder %s2246_s14, %s1748_s13 }
  0x5e   : > { %p1745_p11 = pnand %p1743_p6, %p2254_p12  ;;  %p1751_p2 = scmp.lt.s32.totalorder %s1749_s30, %s1742_s24 }
  0x60   : > { %p1746_p13 = pneg %p1745_p11  ;;  %p1752_p3 = por %p1751_p2, %p1750_p8 }
  0x62   : > { %p1753_p7 = pnand %p1752_p3, %p1746_p13 }
  0x64   : > { %1756 = shalt.err (!%p1753_p7)
}
  0x65   : > { %s2045_s17 = smov 256   ;;  %s2046_s26 = smov 128  }
  0x66   : > { %s2047_s27 = smov 8   ;;  %s2286_s13 = scalar_lea.hbm %s2694_s6, %s1385_s25 }
  0x67   : > { %1580 = dma.hbm_to_vmem [thread:$0]  (!%p2231_p5), %s2242_s7, 256, %s2246_s14, %s2248_s23, %s2045_s17, %s2046_s26, %s2047_s27  }
  0x68   : > { %s2760_s30 = sshll.u32 %s2199_s16, 4  ;;  %s2048_s10 = smov [#allocation9]  }
  0x69   : > { %s422_s1 = scalar_lea.vmem [#allocation12], %s2760_s30  ;;  %s360_s9 = sshll.u32 %s2048_s10, 4  ;;  %s361_s9 = int_to_ptr.vmem [resolvable:$true] %s360_s9 }
  0x6a   : > { %s428_s5 = sshll.u32 %s422_s1, 4  ;;  %s1757_s3 = scalar_lea.hbm %s2690_s2, 1024  ;;  %s2320_s5 = int_to_ptr.vmem [resolvable:$true] %s428_s5 }
  0x6b   : > { %p1758_p2 = scmp.ne.s32.totalorder %s2690_s2, %s1757_s3  ;;  %p2761_p8 = scmp.ne.s32.totalorder %s2753_s15, 0 }
  0x6c   : > { %p1764_p1 = scmp.lt.u32.totalorder %s1757_s3, %s2690_s2 }
  0x6d   : > { %p2762_p0 = pneg %p2761_p8 }
  0x6f   : > { %p1760_p9 = pnand %p1758_p2, %p2762_p0 }
  0x71   : > { %p1761_p10 = pneg %p1760_p9 }
  0x73   : > { %p1766_p4 = pnand %p1764_p1, %p1761_p10 }
  0x75   : > { %1769 = shalt.err (!%p1766_p4)
}
  0x76   : > { %s1770_s1 = scalar_lea.vmem %s361_s9, 1024  ;;  %p2763_p11 = pmov %p2762_p0 }
  0x77   : > { %p1771_p6 = scmp.ne.s32.totalorder %s361_s9, %s1770_s1  ;;  %p1778_p7 = scmp.lt.s32.totalorder %s361_s9, %s361_s9 }
  0x78   : > { %p1779_p5 = scmp.lt.s32.totalorder %s1770_s1, %s1770_s1 }
  0x79   : > { %p1773_p13 = pnand %p1771_p6, %p2763_p11 }
  0x7a   : > { %p1780_p12 = por %p1779_p5, %p1778_p7 }
  0x7b   : > { %p1774_p3 = pneg %p1773_p13 }
  0x7d   : > { %p1781_p0 = pnand %p1780_p12, %p1774_p3 }
  0x7f   : > { %1784 = shalt.err (!%p1781_p0)
}
  0x80   : > { %s2764_s4 = smov 4   ;;  %s2765_s8 = smov 64  }
  0x81   : > { %1573 = dma.hbm_to_vmem [thread:$0]  (!%p2761_p8), %s2690_s2, 1024, %s361_s9, [#allocation8], %s2765_s8, %s2765_s8, %s2764_s4  }
  0x82   : > { %s1382_s21 = sshll.u32 %s2199_s16, 2  ;;  %s1383_s29 = sshll.u32 %s2039_s20, 6 }
  0x83   : > { %s2766_s0 = sld [smem:[#allocation33_spill]]  ;;  %s384_s15 = scalar_lea.vmem [#allocation4], %s1382_s21 }
  0x84   : > { %s391_s30 = sshll.u32 %s384_s15, 4  ;;  %s381_s7 = scalar_lea.sflag [#allocation5], %s2199_s16  ;;  %s392_s30 = int_to_ptr.vmem [resolvable:$true] %s391_s30 }
  0x85   : > { %p2767_p12 = scmp.ne.s32.totalorder %s2759_s22, 0 }
  0x89   : > { %s2318_s11 = scalar_lea.hbm %s2766_s0, %s1383_s29  ;;  %s1790_s4 = scalar_lea.hbm %s2766_s0, 128 }
  0x8a   : > { %s1785_s25 = scalar_lea.hbm %s2318_s11, 64  ;;  %p1791_p9 = scmp.lt.u32.totalorder %s2318_s11, %s2766_s0 }
  0x8b   : > { %p1786_p5 = scmp.ne.s32.totalorder %s2318_s11, %s1785_s25  ;;  %p1792_p10 = scmp.lt.u32.totalorder %s1790_s4, %s1785_s25 }
  0x8c   : > { %p1794_p4 = scmp.lt.u32.totalorder %s1785_s25, %s2318_s11 }
  0x8d   : > { %p1788_p2 = pnand %p1786_p5, %p2767_p12  ;;  %p1793_p1 = por %p1792_p10, %p1791_p9 }
  0x8f   : > { %p1789_p8 = pneg %p1788_p2  ;;  %p1795_p6 = por %p1794_p4, %p1793_p1 }
  0x91   : > { %p1796_p11 = pnand %p1795_p6, %p1789_p8 }
  0x93   : > { %1799 = shalt.err (!%p1796_p11)
}
  0x94   : > { %s1800_s16 = scalar_lea.vmem %s392_s30, 64  ;;  %s2049_s10 = smov [#allocation4]  }
  0x95   : > { %p1801_p13 = scmp.ne.s32.totalorder %s392_s30, %s1800_s16  ;;  %s1805_s21 = sshll.u32 %s2049_s10, 4  ;;  %s1806_s21 = int_to_ptr.vmem [resolvable:$false] %s1805_s21 }
  0x96   : > { %s1807_s29 = scalar_lea.vmem %s1806_s21, 128  ;;  %p1808_p0 = scmp.lt.s32.totalorder %s392_s30, %s1806_s21 }
  0x97   : > { %p1803_p3 = pnand %p1801_p13, %p2767_p12  ;;  %p1809_p5 = scmp.lt.s32.totalorder %s1807_s29, %s1800_s16 }
  0x99   : > { %p1804_p7 = pneg %p1803_p3  ;;  %p1810_p2 = por %p1809_p5, %p1808_p0 }
  0x9b   : > { %p1811_p9 = pnand %p1810_p2, %p1804_p7 }
  0x9d   : > { %1814 = shalt.err (!%p1811_p9)
}
  0x9e   : > { %p2768_p10 = scmp.ne.s32.totalorder %s2757_s19, 0  ;;  %s1815_s14 = scalar_lea.hbm %s2286_s13, 256 }
  0x9f   : > { %p1816_p8 = scmp.ne.s32.totalorder %s2286_s13, %s1815_s14  ;;  %s1820_s25 = scalar_lea.hbm %s2694_s6, 512 }
  0xa0   : > { %1577 = dma.hbm_to_vmem [thread:$0]  (!%p2768_p10), %s2318_s11, 64, %s392_s30, %s381_s7  }
  0xa1   : > { %p1818_p1 = pnand %p1816_p8, %p2767_p12  ;;  %p1821_p6 = scmp.lt.u32.totalorder %s2286_s13, %s2694_s6 }
  0xa2   : > { %p1822_p11 = scmp.lt.u32.totalorder %s1820_s25, %s1815_s14  ;;  %p1824_p3 = scmp.lt.u32.totalorder %s1815_s14, %s2286_s13 }
  0xa3   : > { %p1819_p4 = pneg %p1818_p1 }
  0xa4   : > { %p1823_p13 = por %p1822_p11, %p1821_p6 }
  0xa6   : > { %p1825_p7 = por %p1824_p3, %p1823_p13 }
  0xa8   : > { %p1826_p0 = pnand %p1825_p7, %p1819_p4 }
  0xaa   : > { %1829 = shalt.err (!%p1826_p0)
}
  0xab   : > { %s1830_s11 = scalar_lea.vmem %s2320_s5, 256  ;;  %s2050_s30 = smov [#allocation12]  }
  0xac   : > { %p1831_p5 = scmp.ne.s32.totalorder %s2320_s5, %s1830_s11  ;;  %s1835_s7 = sshll.u32 %s2050_s30, 4  ;;  %s1836_s7 = int_to_ptr.vmem [resolvable:$false] %s1835_s7 }
  0xad   : > { %s1837_s4 = scalar_lea.vmem %s1836_s7, 512  ;;  %p1838_p8 = scmp.lt.s32.totalorder %s2320_s5, %s1836_s7 }
  0xae   : > { %p1833_p2 = pnand %p1831_p5, %p2767_p12  ;;  %p1839_p1 = scmp.lt.s32.totalorder %s1837_s4, %s1830_s11 }
  0xb0   : > { %p1834_p9 = pneg %p1833_p2  ;;  %p1840_p6 = por %p1839_p1, %p1838_p8 }
  0xb2   : > { %p1841_p11 = pnand %p1840_p6, %p1834_p9 }
  0xb4   : > { %1844 = shalt.err (!%p1841_p11)
}
  0xb5   : > { %1583 = dma.hbm_to_vmem [thread:$0]  (!%p2768_p10), %s2286_s13, 256, %s2320_s5, %s2248_s23, %s2045_s17, %s2046_s26, %s2047_s27  }
  0xb6   : > { %p2769_p12 = scmp.ne.s32.totalorder %s2752_s12, 0 }
  0xb7   : > { %s2368_s22 = sand.u32 (!%p2769_p12), 1, %s2031_s18   ;;  %p2770_p4 = scmp.ne.s32.totalorder (!%p2769_p12), %s2747_s28, 0 }
  0xb8   : > { %440 = sbr.rel (%p2769_p12) target bundleno = 1173 (0x495), region = 48  ;;  %s1389_s8 = sshll.u32 (!%p2769_p12), %s2368_s22, 2 }
  0xb9   : > { %s443_s3 = scalar_lea.sflag (!%p2769_p12), [#allocation5], %s2368_s22  ;;  %s2372_s16 = scalar_lea.vmem (!%p2769_p12), [#allocation4], %s1389_s8 }
  0xbf   : > { %2002 = dma.done.wait (%p2770_p4), %s443_s3, 64  }
  0xc0   : > { %2004 = vsyncadd (%p2770_p4), %s443_s3, 4294967232  ;;  %s2771_s19 = sld [smem:[#allocation28_spill]] }
  0xc6   : > { %p2772_p10 = scmp.eq.s32.totalorder %s2771_s19, 0 }
  0xc8   : > { %2006 = dma.done.wait (%p2772_p10), [#allocation8], 2048   ;;  %p2773_p13 = pmov %p2772_p10 }
  0xc9   : > { %s2383_s5 = sand.u32 1, %s2771_s19   ;;  %s1392_s12 = sshll.u32 %s2368_s22, 4 }
  0xca   : > { %2008 = vsyncadd (%p2773_p13), [#allocation8], 4294965248  ;;  %s460_s23 = scalar_lea.sflag [#allocation11], %s2383_s5  ;;  %s2389_s17 = scalar_lea.vmem [#allocation10], %s1392_s12 }
  0xcb   : > { %2010 = dma.done.wait (%p2770_p4), %s460_s23, 512  }
  0xcc   : > { %2012 = vsyncadd (%p2770_p4), %s460_s23, 4294966784  ;;  %v2051_v0 = vmov 0.0   ;;  %vm2052_vm0 = vmmov 0   ;;  %v1651_v1 = vld [vmem:[#allocation9] sm:$0xff]   ;;  %v1652_v2 = vld [vmem:[#allocation9 + $0x8] sm:$0xff]   ;;  %v578_v18 = vlaneseq  ;;  %s2774_s27 = sld [smem:[#allocation36_spill]] }
  0xcd   : > { %1473 = vmatprep.subr.bf16.mxu0 %v2051_v0  ;;  %1489 = vmatprep.mubr.msk.bf16.mxu0 %vm2052_vm0, %v2051_v0  ;;  %v1653_v3 = vld [vmem:[#allocation9 + $0x10] sm:$0xff]   ;;  %v1654_v4 = vld [vmem:[#allocation9 + $0x18] sm:$0xff]   ;;  %v1655_v5 = vld [vmem:[#allocation9 + $0x20] sm:$0xff]   ;;  %s2439_s13 = sshll.u32 %s2368_s22, 3  ;;  %vm874_vm7 = vcmask 7168   ;;  %s2775_s24 = sld [smem:[#allocation35_spill]] }
  0xce   : > { %1493 = vmatprep.subr.bf16.mxu1 %v2051_v0  ;;  %1509 = vmatprep.mubr.msk.bf16.mxu1 %vm2052_vm0, %v2051_v0  ;;  %v1656_v6 = vld [vmem:[#allocation9 + $0x28] sm:$0xff]   ;;  %v1657_v7 = vld [vmem:[#allocation9 + $0x30] sm:$0xff]   ;;  %v1658_v8 = vld [vmem:[#allocation9 + $0x38] sm:$0xff]   ;;  %v2429_v19 = vshrl.u32 %v578_v18, 7  ;;  %s2729_s10 = scalar_lea.vmem [#allocation13], %s2439_s13  ;;  %v2446_v56 = vand.u32 127, %v578_v18 }
  0xcf   : > { %1474 = vmatpush3.bf16.msra.mxu0 %v1651_v1  ;;  %v2409_v9 = vld [vmem:[%s2372_s16] sm:$0xf]  ;;  %v1659_v10 = vld [vmem:[#allocation7] sm:$0xff]   ;;  %v1660_v11 = vld [vmem:[#allocation7 + $0x8] sm:$0xff]   ;;  %v2053_v1 = vmov 1.0|1.0  }
  0xd0   : > { %1475 = vmatprep.subr.bf16.mxu0 %v2051_v0  ;;  %1494 = vmatpush3.bf16.msra.mxu1 %v1659_v10  ;;  %v1661_v12 = vld [vmem:[#allocation7 + $0x10] sm:$0xff]   ;;  %v1662_v13 = vld [vmem:[#allocation7 + $0x18] sm:$0xff]   ;;  %v1663_v14 = vld [vmem:[#allocation7 + $0x20] sm:$0xff]   ;;  %v589_v20 = vsub.s32 0, %v2429_v19  ;;  %vm580_vm5 = vcmp.lt.s32.totalorder %v2446_v56, 16  ;;  %s2453_s21 = scalar_lea.vmem [#allocation14], %s2439_s13 }
  0xd1   : > { %1495 = vmatprep.subr.bf16.mxu1 %v2051_v0  ;;  %v1664_v15 = vld [vmem:[#allocation7 + $0x28] sm:$0xff]   ;;  %v1665_v16 = vld [vmem:[#allocation7 + $0x30] sm:$0xff]   ;;  %v1666_v17 = vld [vmem:[#allocation7 + $0x38] sm:$0xff]   ;;  %vm583_vm8 = vcmp.lt.s32.totalorder %v2446_v56, 32  ;;  %s2472_s15 = scalar_lea.vmem [#allocation16], %s2439_s13  ;;  %s472_s25 = scalar_lea.vmem [#allocation12], %s1392_s12 }
  0xd2   : > { %v577_v21 = vld [vmem:[%s2774_s27] sm:$0x1]  ;;  %v725_v54 = vld [vmem:[%s2389_s17] sm:$0xff]  ;;  %s2481_s9 = scalar_lea.vmem [#allocation17], %s2439_s13  ;;  %s2776_s1 = sld [smem:[#allocation31_spill]] }
  0xd3   : > { %1476 = vmatpush3.bf16.msra.mxu0 %v1652_v2  ;;  %v2435_v22 = vrot.slane %v577_v21, %v589_v20  ;;  %v717_v23 = vand.u32 2147483647, %v577_v21  ;;  %v715_v42 = vsub.f32 0.0, %v577_v21  ;;  %v1424_v55 = vld [vmem:[%s2389_s17 + $0x8] sm:$0xff]  ;;  %s1077_s11 = sshll.u32 %s2453_s21, 4  ;;  %s2499_s30 = sshll.u32 %s2771_s19, 6  ;;  %s2496_s11 = int_to_ptr.vmem [resolvable:$true] %s1077_s11 }
  0xd4   : > { %1477 = vmatprep.subr.bf16.mxu0 %v2051_v0  ;;  %1496 = vmatpush3.bf16.msra.mxu1 %v1660_v11  ;;  %s2777_s8 = sld [smem:[#allocation39_spill]]  ;;  %s2730_s16 = scalar_lea.sflag [#allocation15], %s2383_s5 }
  0xd5   : > { %1497 = vmatprep.subr.bf16.mxu1 %v2051_v0  ;;  %v718_v27 = vsub.f32 0.0, %v717_v23  ;;  %v716_v47 = vmin.f32 %v715_v42, 0.0  ;;  %s1845_s12 = scalar_lea.vmem %s2496_s11, 128  ;;  %s2054_s23 = smov [#allocation14]  }
  0xd6   : > { %p1846_p3 = scmp.ne.s32.totalorder %s2496_s11, %s1845_s12  ;;  %s1849_s17 = sshll.u32 %s2054_s23, 4  ;;  %s1850_s17 = int_to_ptr.vmem [resolvable:$false] %s1849_s17 }
  0xd7   : > { %1478 = vmatpush3.bf16.msra.mxu0 %v1653_v3  ;;  %v719_v32 = vmul.f32 1.442695, %v718_v27  ;;  %s1851_s28 = scalar_lea.vmem %s1850_s17, 256  ;;  %p1852_p2 = scmp.lt.s32.totalorder %s2496_s11, %s1850_s17 }
  0xd8   : > { %1479 = vmatprep.subr.bf16.mxu0 %v2051_v0  ;;  %1498 = vmatpush3.bf16.msra.mxu1 %v1661_v12  ;;  %p2778_p7 = scmp.ne.s32.totalorder %s2776_s1, 0  ;;  %p1853_p9 = scmp.lt.s32.totalorder %s1851_s28, %s1845_s12 }
  0xd9   : > { %1499 = vmatprep.subr.bf16.mxu1 %v2051_v0 }
  0xda   : > { %s2505_s3 = scalar_lea.hbm %s2777_s8, %s2499_s30  ;;  %p1847_p0 = pnand %p1846_p3, %p2778_p7 }
  0xdb   : > { %1480 = vmatpush3.bf16.msra.mxu0 %v1654_v4  ;;  %p1854_p8 = por %p1853_p9, %p1852_p2 }
  0xdc   : > { %1481 = vmatprep.subr.bf16.mxu0 %v2051_v0  ;;  %1500 = vmatpush3.bf16.msra.mxu1 %v1662_v13  ;;  %p1848_p5 = pneg %p1847_p0 }
  0xdd   : > { %1501 = vmatprep.subr.bf16.mxu1 %v2051_v0 }
  0xde   : > { %p1855_p1 = pnand %p1854_p8, %p1848_p5 }
  0xdf   : > { %1482 = vmatpush3.bf16.msra.mxu0 %v1655_v5 }
  0xe0   : > { %1483 = vmatprep.subr.bf16.mxu0 %v2051_v0  ;;  %1502 = vmatpush3.bf16.msra.mxu1 %v1663_v14 }
  0xe1   : > { %1503 = vmatprep.subr.bf16.mxu1 %v2051_v0 }
  0xe3   : > { %1484 = vmatpush3.bf16.msra.mxu0 %v1656_v6 }
  0xe4   : > { %1485 = vmatprep.subr.bf16.mxu0 %v2051_v0  ;;  %1504 = vmatpush3.bf16.msra.mxu1 %v1664_v15 }
  0xe5   : > { %1505 = vmatprep.subr.bf16.mxu1 %v2051_v0 }
  0xe7   : > { %1486 = vmatpush3.bf16.msra.mxu0 %v1657_v7 }
  0xe8   : > { %1487 = vmatprep.subr.bf16.mxu0 %v2051_v0  ;;  %1506 = vmatpush3.bf16.msra.mxu1 %v1665_v16 }
  0xe9   : > { %1507 = vmatprep.subr.bf16.mxu1 %v2051_v0 }
  0xeb   : > { %1488 = vmatpush3.bf16.msra.mxu0 %v1658_v8  ;;  %v1399_v8 = vsel %vm580_vm5, 1.0, %v2051_v0 }
  0xec   : > { %1513 = vmatprep.subr.bf16.mxu0 %v2051_v0  ;;  %1508 = vmatpush3.bf16.msra.mxu1 %v1666_v17 }
  0xee   : > { %1490 = vmatmul.mubr.bf16.vlgmr.msra.gmra.mrb[0].mxu0 %v2409_v9 }
  0xef   : > { %1529 = vmatprep.mubr.msk.bf16.mxu0 %vm2052_vm0, %v2051_v0  ;;  %1514 = vmatpush3.bf16.msra.mxu0 %v1659_v10 }
  0xf0   : > { %1515 = vmatprep.subr.bf16.mxu0 %v2051_v0 }
  0xf3   : > { %1516 = vmatpush3.bf16.msra.mxu0 %v1660_v11 }
  0xf4   : > { %1517 = vmatprep.subr.bf16.mxu0 %v2051_v0 }
  0xf7   : > { %1518 = vmatpush3.bf16.msra.mxu0 %v1661_v12 }
  0xf8   : > { %1519 = vmatprep.subr.bf16.mxu0 %v2051_v0 }
  0xfb   : > { %1520 = vmatpush3.bf16.msra.mxu0 %v1662_v13 }
  0xfc   : > { %1521 = vmatprep.subr.bf16.mxu0 %v2051_v0 }
  0xff   : > { %1522 = vmatpush3.bf16.msra.mxu0 %v1663_v14 }
 0x100   : > { %1523 = vmatprep.subr.bf16.mxu0 %v2051_v0 }
 0x103   : > { %1524 = vmatpush3.bf16.msra.mxu0 %v1664_v15 }
 0x104   : > { %1525 = vmatprep.subr.bf16.mxu0 %v2051_v0 }
 0x107   : > { %1526 = vmatpush3.bf16.msra.mxu0 %v1665_v16 }
 0x108   : > { %1527 = vmatprep.subr.bf16.mxu0 %v2051_v0 }
 0x10b   : > { %1528 = vmatpush3.bf16.msra.mxu0 %v1666_v17 }
 0x1c1   : > { %v674_v24 = vpop.f32.mrb[0].mxu0 }
 0x1c2   : > { %v675_v25 = vadd.f32 %v674_v24, %v2435_v22  ;;  %v1491_v26 = vpop.f32.mrb[1].mxu0 }
 0x1c3   : > { %v677_v28 = vpop.f32.mrb[2].mxu0 }
 0x1c4   : > { %v680_v29 = vand.u32 2147483647, %v675_v25  ;;  %v1492_v30 = vpop.f32.mrb[3].mxu0  ;;  %vm692_vm1 = vcmp.ge.f32.partialorder %v675_v25, 0.0  ;;  %v687_v51 = vmin.f32 %v675_v25, 0.0 }
 0x1c6   : > { %v681_v31 = vsub.f32 0.0, %v680_v29 }
 0x1c8   : > { %v682_v33 = vmul.f32 1.442695, %v681_v31 }
 0x1ca   : > { %1667 = vpow2.f32 %v682_v33  ;;  %v1411_v33 = vld [vmem:[%s2775_s24] ss:$0 sm:$0xff] }
 0x1cb   : > { %1669 = vpow2.f32 %v719_v32 }
 0x1d4   : > { %v1668_v34 = vpop.eup %1667 }
 0x1d5   : > { %v1670_v35 = vpop.eup %1669  ;;  %v684_v36 = vadd.f32 1.0, %v1668_v34 }
 0x1d6   : > { %v721_v37 = vadd.f32 1.0, %v1670_v35 }
 0x1d7   : > { %1671 = vrcp.f32 %v684_v36 }
 0x1d8   : > { %1673 = vlog2.f32 %v721_v37 }
 0x1d9   : > { %1675 = vlog2.f32 %v684_v36 }
 0x1e1   : > { %v1672_v38 = vpop.eup %1671 }
 0x1e2   : > { %v693_v39 = vmul.f32 %v1672_v38, %v1668_v34  ;;  %v1674_v43 = vpop.eup %1673  ;;  %v543_v34 = vunpack.c.l.bf16 %v2409_v9 }
 0x1e3   : > { %v1676_v44 = vpop.eup %1675  ;;  %v723_v48 = vmul.f32 0.6931472, %v1674_v43 }
 0x1e4   : > { %v694_v40 = vsel %vm692_vm1, %v1672_v38, %v693_v39  ;;  %v686_v49 = vmul.f32 0.6931472, %v1676_v44 }
 0x1e5   : > { %v695_v41 = vmax.f32 %v694_v40, 1e-06  ;;  %v724_v53 = vsub.f32 %v716_v47, %v723_v48 }
 0x1e6   : > { %v688_v57 = vsub.f32 %v687_v51, %v686_v49 }
 0x1e7   : > { %v696_v45 = vmin.f32 %v695_v41, 0.999999  ;;  %v741_v59 = vrot.slane %v724_v53, %v589_v20 }
 0x1e8   : > { %v689_v61 = vsub.f32 %v688_v57, %v675_v25 }
 0x1e9   : > { %v1409_v46 = vadd.f32 -0.5, %v696_v45  ;;  %697 = vst [vmem:[%s2729_s10] sm:$0xff] %v696_v45  ;;  %v699_v10 = vsub.f32 1.0, %v696_v45  ;;  %v698_v18 = vmul.f32 %v696_v45, %v688_v57 }
 0x1eb   : > { %v713_v50 = vmul.f32 4.2949673e+09, %v1409_v46  ;;  %v700_v17 = vmul.f32 %v699_v10, %v689_v61  ;;  %v1400_v10 = vsel %vm583_vm8, 1.0, %v2051_v0 }
 0x1ed   : > { %v1535_v52 = vtrunc.f32 %v713_v50  ;;  %v701_v21 = vadd.f32 %v700_v17, %v698_v18 }
 0x1ef   : > { %v1536_v58 = vcvt.f32.s32 %v1535_v52  ;;  %v702_v23 = vmul.f32 %v1399_v8, %v701_v21 }
 0x1f1   : > { %vm726_vm2 = vcmp.lt.s32.totalorder %v725_v54, %v1536_v58  ;;  %vm880_vm3 = vcmp.lt.s32.totalorder %v1424_v55, %v1536_v58 }
 0x1f2   : > { %v1410_v60 = vsel %vm726_vm2, 1.0, %v2051_v0  ;;  %vm1420_vm4 = vmpackc.low %vm726_vm2, %vm726_vm2  ;;  %v1425_v62 = vsel %vm880_vm3, 1.0, %v2051_v0 }
 0x1f3   : > { %v729_v63 = vpack.c.bf16 %v1410_v60, %v1410_v60  ;;  %1510 = vmatmul.mubr.msk.bf16.vlgmr.msra.gmra.mrb[0].mxu1 %vm1420_vm4, %v2053_v1  ;;  %vm1427_vm6 = vmpackc.low %vm880_vm3, %vm880_vm3  ;;  %v736_v2 = vmul.f32 %v1410_v60, %v2435_v22  ;;  %v731_v3 = vmul.f32 %v1410_v60, %v675_v25  ;;  %v883_v4 = vpack.c.bf16 %v1425_v62, %v1425_v62 }
 0x1f4   : > { %1530 = vmatmul.mubr.msk.bf16.vlgmr.msra.gmra.mrb[4].mxu0 %vm1427_vm6, %v2053_v1  ;;  %v886_v5 = vmul.f32 %v1425_v62, %v675_v25  ;;  %v891_v14 = vmul.f32 %v1425_v62, %v2435_v22 }
 0x1f5   : > { %730 = vst [vmem:[%s2453_s21] sm:$0xf] %v729_v63  ;;  %v743_v6 = vadd.f32 %v741_v59, %v736_v2  ;;  %v732_v7 = vadd.f32 %v731_v3, %v689_v61  ;;  %1426 = vst [vmem:[%s2453_s21 + $0x4] sm:$0xf] %v883_v4 }
 0x1f6   : > { %v887_v13 = vadd.f32 %v886_v5, %v689_v61  ;;  %v892_v16 = vadd.f32 %v891_v14, %v741_v59 }
 0x1f7   : > { %v744_v11 = vmul.f32 %v1399_v8, %v743_v6  ;;  %v733_v12 = vmul.f32 %v1399_v8, %v732_v7 }
 0x1f8   : > { %v888_v15 = vmul.f32 %v1399_v8, %v887_v13  ;;  %v893_v20 = vmul.f32 %v1399_v8, %v892_v16 }
 0x1f9   : > { %745 = vadd.xlane.f32.xlu1 %v744_v11  ;;  %734 = vadd.xlane.f32.xlu0 %v733_v12 }
 0x1fd   : > { %889 = vadd.xlane.f32.xlu0 %v888_v15 }
 0x201   : > { %894 = vadd.xlane.f32.xlu0 %v893_v20 }
 0x205   : > { %703 = vadd.xlane.f32.xlu0 %v702_v23 }
 0x286   : > { %v735_v24 = vpop.xlane.xlu0 %734 }
 0x287   : > { %875 = vst.msk [vmem:[#allocation2] sm:$0xff] %vm874_vm7, %v735_v24 }
 0x28a   : > { %v890_v25 = vpop.xlane.xlu0 %889 }
 0x28b   : > { %973 = vst.msk [vmem:[#allocation2 + $0x8] sm:$0xff] %vm874_vm7, %v890_v25 }
 0x28e   : > { %v2463_v22 = vpop.xlane.xlu0 %894 }
 0x292   : > { %v704_v26 = vpop.xlane.xlu0 %703 }
 0x293   : > { %v705_v27 = vrot.slane %v704_v26, 4 }
 0x295   : > { %v706_v28 = vadd.f32 %v705_v27, %v704_v26 }
 0x297   : > { %v707_v29 = vrot.slane %v706_v28, 2 }
 0x299   : > { %v708_v30 = vadd.f32 %v707_v29, %v706_v28  ;;  %v863_v29 = vld [vmem:[%s472_s25] sm:$0xff] }
 0x29b   : > { %v709_v31 = vrot.slane %v708_v30, 1 }
 0x29d   : > { %v710_v32 = vadd.f32 %v709_v31, %v708_v30 }
 0x29f   : > { %1533 = vpush %v710_v32  ;;  %v1431_v32 = vld [vmem:[%s472_s25 + $0x8] sm:$0xff] }
 0x2c6   : > { %v835_v35 = vpop.f32.mrb[0].mxu1 }
 0x2c7   : > { %v836_v36 = vadd.f32 %v1411_v33, %v835_v35  ;;  %v930_v37 = vpop.f32.mrb[4].mxu0  ;;  %v1511_v38 = vpop.f32.mrb[1].mxu1 }
 0x2c8   : > { %v931_v39 = vadd.f32 %v1411_v33, %v930_v37  ;;  %v1531_v40 = vpop.f32.mrb[5].mxu0  ;;  %v838_v41 = vpop.f32.mrb[2].mxu1  ;;  %v978_v38 = vld [vmem:[#allocation2 + $0x8] sm:$0xff] }
 0x2c9   : > { %v841_v42 = vand.u32 2147483647, %v836_v36  ;;  %v933_v43 = vpop.f32.mrb[6].mxu0  ;;  %v1512_v44 = vpop.f32.mrb[3].mxu1  ;;  %v869_v45 = vmul.f32 %v836_v36, %v543_v34  ;;  %v848_v60 = vmin.f32 %v836_v36, 0.0  ;;  %vm853_vm9 = vcmp.ge.f32.partialorder %v836_v36, 0.0 }
 0x2ca   : > { %v936_v46 = vand.u32 2147483647, %v931_v39  ;;  %v1532_v47 = vpop.f32.mrb[7].mxu0  ;;  %v967_v48 = vmul.f32 %v931_v39, %v543_v34  ;;  %v943_v3 = vmin.f32 %v931_v39, 0.0  ;;  %vm948_vm10 = vcmp.ge.f32.partialorder %v931_v39, 0.0 }
 0x2cb   : > { %v842_v49 = vsub.f32 0.0, %v841_v42  ;;  %v982_v40 = vsel %vm874_vm7, %v978_v38, -inf }
 0x2cc   : > { %v937_v50 = vsub.f32 0.0, %v936_v46  ;;  %v746_v46 = vpop.xlane.xlu1 %745 }
 0x2cd   : > { %v843_v51 = vmul.f32 1.442695, %v842_v49 }
 0x2ce   : > { %v938_v52 = vmul.f32 1.442695, %v937_v50 }
 0x2cf   : > { %1677 = vpow2.f32 %v843_v51 }
 0x2d0   : > { %1679 = vpow2.f32 %v938_v52 }
 0x2d9   : > { %v1678_v9 = vpop.eup %1677 }
 0x2da   : > { %v1680_v53 = vpop.eup %1679  ;;  %v845_v54 = vadd.f32 1.0, %v1678_v9 }
 0x2db   : > { %v940_v55 = vadd.f32 1.0, %v1680_v53 }
 0x2dc   : > { %1681 = vlog2.f32 %v845_v54 }
 0x2dd   : > { %1683 = vrcp.f32 %v845_v54 }
 0x2de   : > { %1685 = vlog2.f32 %v940_v55 }
 0x2df   : > { %1687 = vrcp.f32 %v940_v55 }
 0x2e6   : > { %v1682_v57 = vpop.eup %1681 }
 0x2e7   : > { %v1684_v58 = vpop.eup %1683  ;;  %v847_v59 = vmul.f32 0.6931472, %v1682_v57 }
 0x2e8   : > { %v1686_v61 = vpop.eup %1685  ;;  %v854_v62 = vmul.f32 %v1684_v58, %v1678_v9 }
 0x2e9   : > { %v1688_v63 = vpop.eup %1687  ;;  %v849_v1 = vsub.f32 %v848_v60, %v847_v59  ;;  %v942_v2 = vmul.f32 0.6931472, %v1686_v61 }
 0x2ea   : > { %v949_v4 = vmul.f32 %v1688_v63, %v1680_v53  ;;  %v855_v5 = vsel %vm853_vm9, %v1684_v58, %v854_v62 }
 0x2eb   : > { %v850_v6 = vsub.f32 %v849_v1, %v836_v36  ;;  %v944_v7 = vsub.f32 %v943_v3, %v942_v2  ;;  %v856_v8 = vmax.f32 %v855_v5, 1e-06 }
 0x2ec   : > { %v950_v11 = vsel %vm948_vm10, %v1688_v63, %v949_v4 }
 0x2ed   : > { %v870_v12 = vadd.f32 %v869_v45, %v850_v6  ;;  %v945_v13 = vsub.f32 %v944_v7, %v931_v39  ;;  %v857_v14 = vmin.f32 %v856_v8, 0.999999  ;;  %v951_v15 = vmax.f32 %v950_v11, 1e-06  ;;  %v977_v39 = vld [vmem:[#allocation2] sm:$0xff] }
 0x2ee   : > { %v981_v41 = vsel %vm874_vm7, %v977_v39, -inf }
 0x2ef   : > { %v871_v16 = vmul.f32 %v1400_v10, %v870_v12  ;;  %v968_v17 = vadd.f32 %v967_v48, %v945_v13  ;;  %v1422_v18 = vadd.f32 -0.5, %v857_v14  ;;  %v952_v20 = vmin.f32 %v951_v15, 0.999999 }
 0x2f0   : > { %v858_v21 = vpack.c.bf16 %v857_v14, %v857_v14  ;;  %v983_v42 = vmax.f32 %v981_v41, %v982_v40 }
 0x2f1   : > { %872 = vadd.xlane.f32.xlu1 %v871_v16  ;;  %v861_v23 = vmul.f32 4.2949673e+09, %v1422_v18  ;;  %v1430_v24 = vadd.f32 -0.5, %v952_v20  ;;  %v953_v25 = vpack.c.bf16 %v952_v20, %v952_v20  ;;  %v969_v26 = vmul.f32 %v1400_v10, %v968_v17 }
 0x2f2   : > { %859 = vst [vmem:[%s2472_s15] sm:$0xf] %v858_v21  ;;  %v984_v43 = vsub.f32 %v977_v39, %v983_v42  ;;  %v985_v44 = vsub.f32 %v978_v38, %v983_v42 }
 0x2f3   : > { %v1537_v27 = vtrunc.f32 %v861_v23  ;;  %v957_v28 = vmul.f32 4.2949673e+09, %v1430_v24  ;;  %1429 = vst [vmem:[%s2472_s15 + $0x4] sm:$0xf] %v953_v25 }
 0x2f4   : > { %v986_v45 = vmul.f32 1.442695, %v984_v43  ;;  %v988_v47 = vmul.f32 1.442695, %v985_v44 }
 0x2f5   : > { %970 = vadd.xlane.f32.xlu1 %v969_v26  ;;  %v1538_v30 = vcvt.f32.s32 %v1537_v27  ;;  %v1539_v31 = vtrunc.f32 %v957_v28 }
 0x2f6   : > { %1689 = vpow2.f32 %v986_v45 }
 0x2f7   : > { %vm864_vm11 = vcmp.lt.s32.totalorder %v863_v29, %v1538_v30  ;;  %v1540_v33 = vcvt.f32.s32 %v1539_v31  ;;  %1691 = vpow2.f32 %v988_v47 }
 0x2f8   : > { %v1423_v34 = vsel %vm864_vm11, 1.0, %v2051_v0 }
 0x2f9   : > { %v867_v35 = vpack.c.bf16 %v1423_v34, %v1423_v34  ;;  %vm961_vm12 = vcmp.lt.s32.totalorder %v1431_v32, %v1540_v33 }
 0x2fa   : > { %v1432_v36 = vsel %vm961_vm12, 1.0, %v2051_v0 }
 0x2fb   : > { %868 = vst [vmem:[%s2481_s9] sm:$0xf] %v867_v35  ;;  %v964_v37 = vpack.c.bf16 %v1432_v36, %v1432_v36 }
 0x2fd   : > { %1433 = vst [vmem:[%s2481_s9 + $0x4] sm:$0xf] %v964_v37 }
 0x300   : > { %v1690_v51 = vpop.eup %1689 }
 0x301   : > { %v1692_v52 = vpop.eup %1691  ;;  %v1002_v55 = vsel %vm874_vm7, %v1690_v51, 0.0 }
 0x302   : > { %v1003_v57 = vsel %vm874_vm7, %v1692_v52, 0.0 }
 0x303   : > { %v1004_v60 = vadd.f32 %v1003_v57, %v1002_v55 }
 0x305   : > { %1693 = vlog2.f32 %v1004_v60 }
 0x30f   : > { %v1694_v3 = vpop.eup %1693 }
 0x310   : > { %v1006_v4 = vmul.f32 0.6931472, %v1694_v3 }
 0x312   : > { %v1007_v8 = vadd.f32 %v1006_v4, %v983_v42 }
 0x37e   : > { %v873_v0 = vpop.xlane.xlu1 %872 }
 0x37f   : > { %v876_v48 = vadd.f32 %v873_v0, %v746_v46 }
 0x381   : > { %877 = vst.msk [vmem:[#allocation3] sm:$0xff] %vm874_vm7, %v876_v48 }
 0x382   : > { %v971_v49 = vpop.xlane.xlu1 %970 }
 0x383   : > { %v974_v50 = vadd.f32 %v971_v49, %v2463_v22 }
 0x385   : > { %976 = vst.msk [vmem:[#allocation3 + $0x8] sm:$0xff] %vm874_vm7, %v974_v50 }
 0x388   : > { %v979_v9 = vld [vmem:[#allocation3] sm:$0xff] }
 0x389   : > { %v990_v53 = vsub.f32 0.0, %v979_v9 }
 0x38b   : > { %v992_v54 = vmax.f32 %v990_v53, 1e-30 }
 0x38c   : > { %v980_v58 = vld [vmem:[#allocation3 + $0x8] sm:$0xff] }
 0x38d   : > { %v991_v59 = vsub.f32 0.0, %v980_v58  ;;  %v994_v62 = vmul.f32 %v1690_v51, %v992_v54 }
 0x38f   : > { %v993_v61 = vmax.f32 %v991_v59, 1e-30  ;;  %v996_v22 = vsel %vm874_vm7, %v994_v62, 0.0 }
 0x391   : > { %v995_v63 = vmul.f32 %v1692_v52, %v993_v61 }
 0x393   : > { %v997_v1 = vsel %vm874_vm7, %v995_v63, 0.0 }
 0x394   : > { %v998_v2 = vadd.f32 %v997_v1, %v996_v22 }
 0x396   : > { %1695 = vlog2.f32 %v998_v2 }
 0x3a0   : > { %v1696_v5 = vpop.eup %1695 }
 0x3a1   : > { %v1000_v6 = vmul.f32 0.6931472, %v1696_v5 }
 0x3a3   : > { %v1001_v7 = vadd.f32 %v1000_v6, %v983_v42 }
 0x3a5   : > { %v1008_v10 = vsub.f32 %v1001_v7, %v1007_v8 }
 0x3a7   : > { %v1009_v11 = vmul.f32 1.442695, %v1008_v10 }
 0x3a9   : > { %1697 = vpow2.f32 %v1009_v11 }
 0x3b3   : > { %v1698_v12 = vpop.eup %1697 }
 0x3b4   : > { %v1011_v13 = vsel %vm874_vm7, %v1698_v12, 0.0 }
 0x3b5   : > { %1012 = vadd.xlane.f32.xlu1 %v1011_v13 }
 0x3b6   : > { %1858 = shalt.err (!%p1855_p1)
}
 0x3b7   : > { %s1859_s26 = scalar_lea.hbm %s2505_s3, 128  ;;  %s1863_s29 = scalar_lea.hbm %s2777_s8, 256 }
 0x3b8   : > { %p1860_p6 = scmp.ne.s32.totalorder %s2505_s3, %s1859_s26  ;;  %p1864_p4 = scmp.lt.u32.totalorder %s2505_s3, %s2777_s8 }
 0x3b9   : > { %p1865_p10 = scmp.lt.u32.totalorder %s1863_s29, %s1859_s26  ;;  %p1867_p3 = scmp.lt.u32.totalorder %s1859_s26, %s2505_s3 }
 0x3ba   : > { %p1861_p11 = pnand %p1860_p6, %p2778_p7 }
 0x3bb   : > { %p1866_p13 = por %p1865_p10, %p1864_p4 }
 0x3bc   : > { %p1862_p12 = pneg %p1861_p11 }
 0x3bd   : > { %p1868_p0 = por %p1867_p3, %p1866_p13 }
 0x3bf   : > { %p1869_p5 = pnand %p1868_p0, %p1862_p12 }
 0x3c1   : > { %1872 = shalt.err (!%p1869_p5)
}
 0x3c2   : > { %s2055_s25 = smov 64   ;;  %s2056_s7 = smov 128  }
 0x3c3   : > { %s2057_s4 = smov 4   ;;  %s2779_s17 = sld [smem:[#allocation40_spill]] }
 0x3c4   : > { %1558 = dma.vmem_to_hbm [thread:$0]  (%p2778_p7), %s2496_s11, 128, %s2505_s3, %s2730_s16, %s2055_s25, %s2056_s7, %s2057_s4  }
 0x3c5   : > { %s2781_s29 = sld [smem:[#allocation41_spill]]  ;;  %s1107_s24 = sshll.u32 %s2481_s9, 4  ;;  %s2547_s24 = int_to_ptr.vmem [resolvable:$true] %s1107_s24 }
 0x3c6   : > { %s1047_s10 = scalar_lea.sflag [#allocation18], %s2383_s5  ;;  %s1873_s0 = scalar_lea.vmem %s2547_s24, 128 }
 0x3c7   : > { %p1874_p2 = scmp.ne.s32.totalorder %s2547_s24, %s1873_s0  ;;  %s2058_s11 = smov [#allocation17]  }
 0x3c8   : > { %s1877_s3 = sshll.u32 %s2058_s11, 4  ;;  %s1878_s3 = int_to_ptr.vmem [resolvable:$false] %s1877_s3 }
 0x3c9   : > { %s2780_s28 = smov %s2779_s17  ;;  %s2538_s26 = scalar_lea.hbm %s2779_s17, %s2499_s30 }
 0x3ca   : > { %p1875_p9 = pnand %p1874_p2, %p2778_p7  ;;  %s1879_s12 = scalar_lea.vmem %s1878_s3, 256 }
 0x3cb   : > { %s2544_s14 = scalar_lea.hbm %s2781_s29, %s2499_s30  ;;  %p1880_p1 = scmp.lt.s32.totalorder %s2547_s24, %s1878_s3 }
 0x3cc   : > { %p1876_p8 = pneg %p1875_p9  ;;  %p1881_p6 = scmp.lt.s32.totalorder %s1879_s12, %s1873_s0 }
 0x3ce   : > { %p1882_p11 = por %p1881_p6, %p1880_p1 }
 0x3d0   : > { %p1883_p12 = pnand %p1882_p11, %p1876_p8 }
 0x3d2   : > { %1886 = shalt.err (!%p1883_p12)
}
 0x3d3   : > { %s1887_s9 = scalar_lea.hbm %s2544_s14, 128  ;;  %s1891_s17 = scalar_lea.hbm %s2781_s29, 256 }
 0x3d4   : > { %p1888_p4 = scmp.ne.s32.totalorder %s2544_s14, %s1887_s9  ;;  %p1892_p3 = scmp.lt.u32.totalorder %s2544_s14, %s2781_s29 }
 0x3d5   : > { %p1893_p0 = scmp.lt.u32.totalorder %s1891_s17, %s1887_s9  ;;  %p1895_p2 = scmp.lt.u32.totalorder %s1887_s9, %s2544_s14 }
 0x3d6   : > { %p1889_p10 = pnand %p1888_p4, %p2778_p7 }
 0x3d7   : > { %p1894_p5 = por %p1893_p0, %p1892_p3 }
 0x3d8   : > { %p1890_p13 = pneg %p1889_p10 }
 0x3d9   : > { %p1896_p9 = por %p1895_p2, %p1894_p5 }
 0x3db   : > { %p1897_p8 = pnand %p1896_p9, %p1890_p13 }
 0x3dd   : > { %1900 = shalt.err (!%p1897_p8)
}
 0x3de   : > { %1560 = dma.vmem_to_hbm [thread:$0]  (%p2778_p7), %s2547_s24, 128, %s2544_s14, %s1047_s10, %s2055_s25, %s2056_s7, %s2057_s4  }
 0x3df   : > { %s1439_s0 = sshll.u32 %s2771_s19, 7  ;;  %s2782_s11 = scalar_lea.vmem [#allocation13], %s2439_s13 }
 0x3e0   : > { %s1065_s3 = sshll.u32 %s2782_s11, 4  ;;  %s2783_s30 = sld [smem:[#allocation38_spill]]  ;;  %s1066_s3 = int_to_ptr.vmem [resolvable:$true] %s1065_s3 }
 0x3e1   : > { %s1032_s17 = scalar_lea.sflag [#allocation6], %s2368_s22  ;;  %s1901_s27 = scalar_lea.vmem %s1066_s3, 128 }
 0x3e2   : > { %p1902_p1 = scmp.ne.s32.totalorder %s1066_s3, %s1901_s27  ;;  %s2059_s21 = smov [#allocation13]  }
 0x3e3   : > { %s1905_s16 = sshll.u32 %s2059_s21, 4  ;;  %s1906_s16 = int_to_ptr.vmem [resolvable:$false] %s1905_s16 }
 0x3e4   : > { %p1903_p6 = pnand %p1902_p1, %p2778_p7  ;;  %s1907_s14 = scalar_lea.vmem %s1906_s16, 256 }
 0x3e5   : > { %p1908_p12 = scmp.lt.s32.totalorder %s1066_s3, %s1906_s16  ;;  %p1909_p4 = scmp.lt.s32.totalorder %s1907_s14, %s1901_s27 }
 0x3e6   : > { %s2584_s23 = scalar_lea.hbm %s2783_s30, %s1439_s0  ;;  %p1904_p11 = pneg %p1903_p6 }
 0x3e7   : > { %p1910_p10 = por %p1909_p4, %p1908_p12 }
 0x3e9   : > { %p1911_p13 = pnand %p1910_p10, %p1904_p11 }
 0x3eb   : > { %1914 = shalt.err (!%p1911_p13)
}
 0x3ec   : > { %s1915_s22 = scalar_lea.hbm %s2584_s23, 128  ;;  %s1919_s12 = scalar_lea.hbm %s2783_s30, 256 }
 0x3ed   : > { %p1916_p3 = scmp.ne.s32.totalorder %s2584_s23, %s1915_s22  ;;  %p1920_p2 = scmp.lt.u32.totalorder %s2584_s23, %s2783_s30 }
 0x3ee   : > { %p1921_p9 = scmp.lt.u32.totalorder %s1919_s12, %s1915_s22  ;;  %p1923_p1 = scmp.lt.u32.totalorder %s1915_s22, %s2584_s23 }
 0x3ef   : > { %p1917_p0 = pnand %p1916_p3, %p2778_p7 }
 0x3f0   : > { %p1922_p8 = por %p1921_p9, %p1920_p2 }
 0x3f1   : > { %p1918_p5 = pneg %p1917_p0 }
 0x3f2   : > { %p1924_p6 = por %p1923_p1, %p1922_p8 }
 0x3f4   : > { %p1925_p11 = pnand %p1924_p6, %p1918_p5 }
 0x3f6   : > { %1928 = shalt.err (!%p1925_p11)
}
 0x3f7   : > { %1557 = dma.vmem_to_hbm [thread:$0]  (%p2778_p7), %s1066_s3, 128, %s2584_s23, %s1032_s17  }
 0x3f8   : > { %s1092_s27 = sshll.u32 %s2472_s15, 4  ;;  %s2060_s14 = smov [#allocation16]   ;;  %s2605_s27 = int_to_ptr.vmem [resolvable:$true] %s1092_s27 }
 0x3f9   : > { %s1929_s21 = scalar_lea.vmem %s2605_s27, 128  ;;  %s1933_s22 = sshll.u32 %s2060_s14, 4  ;;  %s1934_s22 = int_to_ptr.vmem [resolvable:$false] %s1933_s22 }
 0x3fa   : > { %p1930_p12 = scmp.ne.s32.totalorder %s2605_s27, %s1929_s21  ;;  %s1935_s24 = scalar_lea.vmem %s1934_s22, 256 }
 0x3fb   : > { %p1936_p13 = scmp.lt.s32.totalorder %s2605_s27, %s1934_s22  ;;  %p1937_p3 = scmp.lt.s32.totalorder %s1935_s24, %s1929_s21 }
 0x3fc   : > { %p1931_p4 = pnand %p1930_p12, %p2778_p7 }
 0x3fd   : > { %p1938_p0 = por %p1937_p3, %p1936_p13 }
 0x3fe   : > { %p1932_p10 = pneg %p1931_p4 }
 0x400   : > { %p1939_p5 = pnand %p1938_p0, %p1932_p10 }
 0x402   : > { %1942 = shalt.err (!%p1939_p5)
}
 0x403   : > { %s1943_s15 = scalar_lea.hbm %s2538_s26, 128  ;;  %s1947_s17 = scalar_lea.hbm %s2780_s28, 256 }
 0x404   : > { %p1944_p2 = scmp.ne.s32.totalorder %s2538_s26, %s1943_s15  ;;  %p1948_p1 = scmp.lt.u32.totalorder %s2538_s26, %s2780_s28 }
 0x405   : > { %p1949_p6 = scmp.lt.u32.totalorder %s1947_s17, %s1943_s15  ;;  %p1951_p12 = scmp.lt.u32.totalorder %s1943_s15, %s2538_s26 }
 0x406   : > { %p1945_p9 = pnand %p1944_p2, %p2778_p7 }
 0x407   : > { %p1950_p11 = por %p1949_p6, %p1948_p1 }
 0x408   : > { %p1946_p8 = pneg %p1945_p9 }
 0x409   : > { %p1952_p4 = por %p1951_p12, %p1950_p11 }
 0x40b   : > { %p1953_p10 = pnand %p1952_p4, %p1946_p8 }
 0x40d   : > { %1956 = shalt.err (!%p1953_p10)
}
 0x40e   : > { %s2784_s9 = scalar_lea.sflag [#allocation15], %s2383_s5  ;;  %s1534_s16 = spop %1533  ;;  %vm1025_vm13 = vcmp.eq.s32.totalorder %v2429_v19, 0  ;;  %vm1026_vm14 = vcmp.eq.s32.totalorder %v2446_v56, 0 }
 0x40f   : > { %1559 = dma.vmem_to_hbm [thread:$0]  (%p2778_p7), %s2605_s27, 128, %s2538_s26, %s2784_s9, %s2055_s25, %s2056_s7, %s2057_s4   ;;  %vm1027_vm15 = vmand %vm1025_vm13, %vm1026_vm14 }
 0x410   : > { %s540_s22 = scalar_lea.vmem [#allocation19], %s2439_s13  ;;  %s2785_s26 = sld [smem:[#allocation42_spill]] }
 0x411   : > { %s1123_s24 = sshll.u32 %s540_s22, 4  ;;  %s2061_s13 = smov [#allocation19]   ;;  %s2643_s24 = int_to_ptr.vmem [resolvable:$true] %s1123_s24 }
 0x412   : > { %s1957_s15 = scalar_lea.vmem %s2643_s24, 128  ;;  %s1961_s3 = sshll.u32 %s2061_s13, 4  ;;  %s1962_s3 = int_to_ptr.vmem [resolvable:$false] %s1961_s3 }
 0x413   : > { %p1958_p13 = scmp.ne.s32.totalorder %s2643_s24, %s1957_s15  ;;  %s1963_s19 = scalar_lea.vmem %s1962_s3, 256 }
 0x414   : > { %p1964_p5 = scmp.lt.s32.totalorder %s2643_s24, %s1962_s3  ;;  %p1965_p2 = scmp.lt.s32.totalorder %s1963_s19, %s1957_s15 }
 0x415   : > { %p1959_p3 = pnand %p1958_p13, %p2778_p7 }
 0x416   : > { %s2641_s27 = scalar_lea.hbm %s2785_s26, %s1439_s0  ;;  %p1966_p9 = por %p1965_p2, %p1964_p5 }
 0x417   : > { %p1960_p0 = pneg %p1959_p3 }
 0x419   : > { %p1967_p8 = pnand %p1966_p9, %p1960_p0 }
 0x442   : > { %v1013_v14 = vpop.xlane.xlu1 %1012 }
 0x443   : > { %v1014_v15 = vrot.slane %v1013_v14, 4 }
 0x445   : > { %v1015_v16 = vadd.f32 %v1014_v15, %v1013_v14 }
 0x447   : > { %v1016_v17 = vrot.slane %v1015_v16, 2 }
 0x449   : > { %v1017_v18 = vadd.f32 %v1016_v17, %v1015_v16 }
 0x44b   : > { %v1018_v20 = vrot.slane %v1017_v18, 1 }
 0x44d   : > { %v1019_v21 = vadd.f32 %v1018_v20, %v1017_v18 }
 0x44f   : > { %1541 = vpush %v1019_v21 }
 0x480   : > { %s1542_s21 = spop %1541 }
 0x481   : > { %s1021_s14 = smul.f32 -1.0, %s1542_s21 }
 0x483   : > { %s1022_s25 = ssub.f32 %s1021_s14, %s1534_s16 }
 0x485   : > { %v1028_v23 = vstv %s1022_s25 }
 0x486   : > { %v1029_v19 = vsel %vm1027_vm15, %v1028_v23, 0.0 }
 0x487   : > { %1030 = vst [vmem:[%s540_s22] sm:$0xff] %v1029_v19 }
 0x488   : > { %1970 = shalt.err (!%p1967_p8)
}
 0x489   : > { %s1971_s0 = scalar_lea.hbm %s2641_s27, 128  ;;  %s1975_s11 = scalar_lea.hbm %s2785_s26, 256 }
 0x48a   : > { %p1972_p1 = scmp.ne.s32.totalorder %s2641_s27, %s1971_s0  ;;  %p1976_p12 = scmp.lt.u32.totalorder %s2641_s27, %s2785_s26 }
 0x48b   : > { %p1977_p4 = scmp.lt.u32.totalorder %s1975_s11, %s1971_s0  ;;  %p1979_p13 = scmp.lt.u32.totalorder %s1971_s0, %s2641_s27 }
 0x48c   : > { %p1973_p6 = pnand %p1972_p1, %p2778_p7 }
 0x48d   : > { %p1978_p10 = por %p1977_p4, %p1976_p12 }
 0x48e   : > { %p1974_p11 = pneg %p1973_p6 }
 0x48f   : > { %p1980_p3 = por %p1979_p13, %p1978_p10 }
 0x491   : > { %p1981_p0 = pnand %p1980_p3, %p1974_p11 }
 0x493   : > { %1984 = shalt.err (!%p1981_p0)
}
 0x494   : > { %1561 = dma.vmem_to_hbm [thread:$0]  (%p2778_p7), %s2643_s24, 128, %s2641_s27, %s1047_s10  }
 0x495 PF: > { %s2786_s16 = sld [smem:[#allocation26_spill]]  ;;  %s2787_s21 = sld [smem:[#allocation32_spill]] }
 0x496   : > { %p2789_p2 = scmp.ge.s32.totalorder %s2039_s20, 2 }
 0x49b   : > { %s1135_s14 = sand.u32 1, %s2786_s16   ;;  %p2788_p5 = scmp.ne.s32.totalorder %s2787_s21, 0 }
 0x49c   : > { %s1136_s22 = scalar_lea.sflag [#allocation6], %s1135_s14 }
 0x49d   : > { %p1585_p9 = pnand %p2789_p2, %p2788_p5 }
 0x49f   : > { %2014 = dma.done.wait (!%p1585_p9), %s1136_s22, 128  }
 0x4a0   : > { %2016 = vsyncadd (!%p1585_p9), %s1136_s22, 4294967168  ;;  %s2790_s25 = sadd.s32 4294967294, %s2039_s20  }
 0x4a1   : > { %s1144_s7 = sand.u32 1, %s2790_s25  }
 0x4a2   : > { %s1145_s1 = scalar_lea.sflag [#allocation15], %s1144_s7 }
 0x4a3   : > { %2018 = dma.done.wait (!%p1585_p9), %s1145_s1, 256  }
 0x4a4   : > { %2020 = vsyncadd (!%p1585_p9), %s1145_s1, 4294967040  ;;  %s1163_s5 = scalar_lea.sflag [#allocation18], %s1144_s7 }
 0x4a5   : > { %2022 = dma.done.wait (!%p1585_p9), %s1163_s5, 256  }
 0x4a6   : > { %2024 = vsyncadd (!%p1585_p9), %s1163_s5, 4294967040  ;;  %s2791_s20 = sld [smem:[#allocation29_spill]]  ;;  %s2792_s10 = sld [smem:[#allocation27_spill]] }
 0x4a7   : > { %s2793_s19 = sld [smem:[#allocation30_spill]]  ;;  %s2794_s17 = smov %s2031_s18 }
 0x4ac   : > { %p35_p7 = scmp.ge.s32.totalorder %s2791_s20, 4   ;;  %s2795_s18 = smov %s2792_s10 }
 0x4ae   :  { %37 = sbr.rel (!%p35_p7) target bundleno = 23 (0x17), region = 196 }
 0x4b5   :  { %1177 = vsyncpa [#allocation5], 1 }
 0x4b6   :  { %1179 = vsyncpa [#allocation5 + $0x1], 1 }
 0x4b7   :  { %1180 = vsyncpa [#allocation8], 1 }
 0x4b8   :  { %1181 = vsyncpa [#allocation11], 1 }
 0x4b9   :  { %1183 = vsyncpa [#allocation11 + $0x1], 1 }
 0x4ba   :  { %1184 = vsyncpa [#allocation6], 1 }
 0x4bb   :  { %1186 = vsyncpa [#allocation6 + $0x1], 1 }
 0x4bc   :  { %1187 = vsyncpa [#allocation15], 1 }
 0x4bd   :  { %1189 = vsyncpa [#allocation15 + $0x1], 1 }
 0x4be   :  { %1190 = vsyncpa [#allocation18], 1 }
 0x4bf   :  { %1192 = vsyncpa [#allocation18 + $0x1], 1 }

</bundles_post_ra>
